<compile_context>
chip_gen: v6e
topology: v6e:2x2x1
jax: 0.10.0
libtpu: 0.0.40
codegen_flags: <defaults>
</compile_context>

<pallas_src>
import functools

import jax
import jax.numpy as jnp
from jax import lax
from jax.experimental import pallas as pl
from jax.experimental.pallas import tpu as pltpu


def _noisy_gru_seq_kernel(x_ref, h0_ref, noise_ref,
                          wcat_ref, bgate_ref, wout_ref, bout_ref,
                          out_ref, hfin_ref,
                          *, noise_level):
    """TB GRU steps per grid iteration; hidden carried in the resident hfin block."""
    tb_idx = pl.program_id(1)
    TB = x_ref.shape[0]
    H = hfin_ref.shape[-1]

    @pl.when(tb_idx == 0)
    def _():
        # New batch tile: (re)load the initial hidden state into the carry
        # (the hfin output block is VMEM-resident across the time grid axis).
        hfin_ref[...] = h0_ref[...].astype(hfin_ref.dtype)

    # Weights/biases are resident in VMEM (constant index_maps); hoist the loads.
    wcat = wcat_ref[...]       # (I+H, 4H)  cols [r | z | n_input | n_hidden]
    bgate = bgate_ref[...]     # (1, 4H)    biases pre-folded per column block
    wout = wout_ref[...]       # (H, O)
    bout = bout_ref[...]       # (1, O)

    def step(s, h):
        x = x_ref[s].astype(jnp.float32)                     # (bt, I)
        # Single merged matmul over the [x | h] concatenation (one MXU push/pop).
        xh = jnp.concatenate([x, h], axis=-1)                # (bt, I+H)
        g = jnp.dot(xh, wcat, preferred_element_type=jnp.float32) + bgate

        rz = jax.nn.sigmoid(g[:, :2 * H])                    # one EUP push for r and z
        r = rz[:, :H]
        z = rz[:, H:]
        n = jnp.tanh(g[:, 2 * H:3 * H] + r * g[:, 3 * H:])
        h_new = n + z * (h - n)                              # == (1 - z)*n + z*h

        # Readout on the PRE-noise hidden; store one step's (bt, O) row block.
        out = jnp.dot(h_new, wout, preferred_element_type=jnp.float32) + bout
        out_ref[s] = out.astype(out_ref.dtype)

        # Noise only enters the recurrent / returned hidden state.
        return h_new + noise_level * noise_ref[s].astype(jnp.float32)

    h_final = lax.fori_loop(0, TB, step,
                            hfin_ref[...].astype(jnp.float32),
                            unroll=True)
    hfin_ref[...] = h_final.astype(hfin_ref.dtype)


def _pick_time_block(T, cap=64):
    """Largest time block <= cap that divides T (full T when it fits)."""
    if T <= cap:
        return T
    tb = cap
    while T % tb:
        tb -= 1
    return tb


def noisy_gru_rnn_rollout(xs, h0, w_ih, w_hh, b_ih, b_hh, w_out, b_out,
                          noise, noise_level, *, batch_block=None, time_block=None):
    """Fused T-step NoisyGRU_RNN rollout in a single pallas_call.

    xs:(T,B,I) h0:(B,H) w_ih:(3H,I) w_hh:(3H,H) b_ih/b_hh:(3H,)
    w_out:(O,H) b_out:(O,) noise:(T,B,H) ~ N(0,1) (scaled by noise_level in-kernel)
    Returns (outputs (T,B,O), final (noisy) hidden (B,H)).
    """
    T, B, I = xs.shape
    H = h0.shape[1]
    O = w_out.shape[0]
    f32 = jnp.float32

    # ---- one-time host-side layout plumbing (outside the time loop) ----------
    # Merged [x | h] gate weight slab (I+H, 4H), columns [r | z | n_in | n_hid].
    wih_t = jnp.transpose(w_ih).astype(f32)                  # (I, 3H) cols [r,z,n]
    whh_t = jnp.transpose(w_hh).astype(f32)                  # (H, 3H)
    w_top = jnp.concatenate([wih_t[:, :3 * H], jnp.zeros((I, H), f32)], axis=1)
    w_bot = jnp.concatenate([whh_t[:, :2 * H], jnp.zeros((H, H), f32),
                             whh_t[:, 2 * H:]], axis=1)
    wcat = jnp.concatenate([w_top, w_bot], axis=0)           # (I+H, 4H)
    bgate = jnp.concatenate([b_ih[:2 * H] + b_hh[:2 * H],
                             b_ih[2 * H:], b_hh[2 * H:]]).astype(f32).reshape(1, 4 * H)

    wout_t = jnp.transpose(w_out).astype(f32)                # (H, O)
    bout2 = b_out.astype(f32).reshape(1, O)

    # ---- tiling ---------------------------------------------------------------
    bt = B if batch_block is None else min(int(batch_block), B)
    if B % bt != 0:
        raise ValueError("batch_block must divide B (pad B host-side otherwise)")
    if bt != B and bt % 8 != 0:
        raise ValueError("batch_block must be a multiple of 8 (f32 sublane tile)")
    nb = B // bt

    TB = _pick_time_block(T) if time_block is None else int(time_block)
    if T % TB != 0:
        raise ValueError("time_block must divide T")
    nt = T // TB

    # ---- explicit VMEM budget (resident weights + double-buffered streams) ----
    weights_b = 4 * (wcat.size + bgate.size + wout_t.size + bout2.size)
    streamed_b = 2 * 4 * (TB * bt * (I + H + O))
    state_b = 2 * 4 * (2 * bt * H)
    vmem_limit = int(min(max(2 * (2 * weights_b + streamed_b + state_b),
                             8 * 1024 * 1024), 48 * 1024 * 1024))

    grid_spec = pltpu.PrefetchScalarGridSpec(
        num_scalar_prefetch=0,
        grid=(nb, nt),                                        # (batch tiles, time blocks)
        in_specs=[
            pl.BlockSpec((TB, bt, I), lambda b, t: (t, b, 0)),   # x block (streamed)
            pl.BlockSpec((bt, H), lambda b, t: (b, 0)),          # h0 (per batch tile)
            pl.BlockSpec((TB, bt, H), lambda b, t: (t, b, 0)),   # noise block (streamed)
            pl.BlockSpec((I + H, 4 * H), lambda b, t: (0, 0)),   # merged gate weights
            pl.BlockSpec((1, 4 * H), lambda b, t: (0, 0)),       # folded gate bias
            pl.BlockSpec((H, O), lambda b, t: (0, 0)),           # W_out (resident)
            pl.BlockSpec((1, O), lambda b, t: (0, 0)),           # b_out (resident)
        ],
        out_specs=(
            pl.BlockSpec((TB, bt, O), lambda b, t: (t, b, 0)),   # per-step outputs
            pl.BlockSpec((bt, H), lambda b, t: (b, 0)),          # final hidden = carry
        ),
    )

    cost = pl.CostEstimate(
        flops=2 * T * B * ((I + H) * 4 * H + H * O),
        transcendentals=T * B * 3 * H,
        bytes_accessed=4 * (xs.size + noise.size + h0.size
                            + wcat.size + T * B * O + B * H))

    outs, h_final = pl.pallas_call(
        functools.partial(_noisy_gru_seq_kernel, noise_level=float(noise_level)),
        grid_spec=grid_spec,
        out_shape=(jax.ShapeDtypeStruct((T, B, O), xs.dtype),
                   jax.ShapeDtypeStruct((B, H), xs.dtype)),
        compiler_params=pltpu.CompilerParams(
            dimension_semantics=("parallel", "arbitrary"),       # batch ||, time sequential
            vmem_limit_bytes=vmem_limit),
        cost_estimate=cost,
    )(xs, h0, noise, wcat, bgate, wout_t, bout2)

    return outs, h_final


def noisy_gru_rnn_forward(x, h, w_ih, w_hh, b_ih, b_hh, w_out, b_out,
                          noise, noise_level):
    """Single-step forward matching NoisyGRU_RNN.forward: returns (output, hidden)."""
    outs, h_next = noisy_gru_rnn_rollout(x[None], h, w_ih, w_hh, b_ih, b_hh,
                                         w_out, b_out, noise[None], noise_level)
    return outs[0], h_next


# ------------------------------ reference ------------------------------------
def _gru_step_reference(x, h, w_ih, w_hh, b_ih, b_hh, w_out, b_out, noise, noise_level):
    H = h.shape[1]
    gi = x @ w_ih.T + b_ih
    gh = h @ w_hh.T + b_hh
    r = jax.nn.sigmoid(gi[:, :H] + gh[:, :H])
    z = jax.nn.sigmoid(gi[:, H:2 * H] + gh[:, H:2 * H])
    n = jnp.tanh(gi[:, 2 * H:] + r * gh[:, 2 * H:])
    h_new = (1.0 - z) * n + z * h
    out = h_new @ w_out.T + b_out
    return out, h_new + noise_level * noise


def _rollout_reference(xs, h0, w_ih, w_hh, b_ih, b_hh, w_out, b_out, noise, noise_level):
    h = h0
    outs = []
    for t in range(xs.shape[0]):
        o, h = _gru_step_reference(xs[t], h, w_ih, w_hh, b_ih, b_hh,
                                   w_out, b_out, noise[t], noise_level)
        outs.append(o)
    return jnp.stack(outs, axis=0), h


if __name__ == "__main__":
    T, B, I, H, O = 12, 8, 16, 32, 8      # seq, batch, input_size, latent_size, output_size
    noise_level = 0.05

    key = jax.random.PRNGKey(0)
    keys = jax.random.split(key, 9)
    bound = 1.0 / jnp.sqrt(H)             # PyTorch GRUCell / Linear default init range
    xs = jax.random.normal(keys[0], (T, B, I), jnp.float32)
    h0 = jax.random.normal(keys[1], (B, H), jnp.float32)
    w_ih = jax.random.uniform(keys[2], (3 * H, I), jnp.float32, -bound, bound)
    w_hh = jax.random.uniform(keys[3], (3 * H, H), jnp.float32, -bound, bound)
    b_ih = jax.random.uniform(keys[4], (3 * H,), jnp.float32, -bound, bound)
    b_hh = jax.random.uniform(keys[5], (3 * H,), jnp.float32, -bound, bound)
    w_out = jax.random.uniform(keys[6], (O, H), jnp.float32, -bound, bound)
    b_out = jax.random.uniform(keys[7], (O,), jnp.float32, -bound, bound)
    noise = jax.random.normal(keys[8], (T, B, H), jnp.float32)   # randn_like(hidden) per step

    # Fused T-step rollout (single pallas_call, one grid step per batch tile).
    outs, h_last = noisy_gru_rnn_rollout(xs, h0, w_ih, w_hh, b_ih, b_hh,
                                         w_out, b_out, noise, noise_level)
    jax.block_until_ready((outs, h_last))

    ref_outs, ref_h = _rollout_reference(xs, h0, w_ih, w_hh, b_ih, b_hh,
                                         w_out, b_out, noise, noise_level)
    assert outs.shape == (T, B, O) and h_last.shape == (B, H)
    assert jnp.allclose(outs, ref_outs, atol=2e-5, rtol=2e-5)
    assert jnp.allclose(h_last, ref_h, atol=2e-5, rtol=2e-5)

    # Single-step call (exactly the PyTorch module's forward signature/semantics).
    out1, h1 = noisy_gru_rnn_forward(xs[0], h0, w_ih, w_hh, b_ih, b_hh,
                                     w_out, b_out, noise[0], noise_level)
    ref_o1, ref_h1 = _gru_step_reference(xs[0], h0, w_ih, w_hh, b_ih, b_hh,
                                         w_out, b_out, noise[0], noise_level)
    assert jnp.allclose(out1, ref_o1, atol=1e-5, rtol=1e-5)
    assert jnp.allclose(h1, ref_h1, atol=1e-5, rtol=1e-5)

    print("KERNEL_OK")
</pallas_src>

<mosaic_0001>
module attributes {stable_mosaic.version = 11 : i64} {
  func.func @_noisy_gru_seq_kernel(%arg0: i32, %arg1: i32, %arg2: memref<12x8x16xf32, #tpu.memory_space<vmem>>, %arg3: memref<8x32xf32, #tpu.memory_space<vmem>>, %arg4: memref<12x8x32xf32, #tpu.memory_space<vmem>>, %arg5: memref<48x128xf32, #tpu.memory_space<vmem>>, %arg6: memref<1x128xf32, #tpu.memory_space<vmem>>, %arg7: memref<32x8xf32, #tpu.memory_space<vmem>>, %arg8: memref<1x8xf32, #tpu.memory_space<vmem>>, %arg9: memref<12x8x8xf32, #tpu.memory_space<vmem>>, %arg10: memref<8x32xf32, #tpu.memory_space<vmem>>) attributes {dimension_semantics = [#tpu.dimension_semantics<parallel>, #tpu.dimension_semantics<arbitrary>], iteration_bounds = array<i64: 1, 1>, scalar_prefetch = 0 : i64, scratch_operands = 0 : i64, tpu.core_type = #tpu.core_type<tc>, window_params = [{transform_indices = @transform_0, window_bounds = array<i64: 12, 8, 16>}, {transform_indices = @transform_1, window_bounds = array<i64: 8, 32>}, {transform_indices = @transform_2, window_bounds = array<i64: 12, 8, 32>}, {pipeline_mode = #tpu.pipeline_mode<synchronous>, transform_indices = @transform_3, window_bounds = array<i64: 48, 128>}, {pipeline_mode = #tpu.pipeline_mode<synchronous>, transform_indices = @transform_4, window_bounds = array<i64: 1, 128>}, {pipeline_mode = #tpu.pipeline_mode<synchronous>, transform_indices = @transform_5, window_bounds = array<i64: 32, 8>}, {pipeline_mode = #tpu.pipeline_mode<synchronous>, transform_indices = @transform_6, window_bounds = array<i64: 1, 8>}, {transform_indices = @transform_7, window_bounds = array<i64: 12, 8, 8>}, {transform_indices = @transform_8, window_bounds = array<i64: 8, 32>}]} {
    %c0_i32 = arith.constant 0 : i32
    %0 = arith.cmpi eq, %arg1, %c0_i32 : i32
    %1 = arith.extui %0 : i1 to i32
    %c0_i32_0 = arith.constant 0 : i32
    %2 = arith.cmpi ne, %1, %c0_i32_0 : i32
    scf.if %2 {
      %c0_132 = arith.constant 0 : index
      %c0_133 = arith.constant 0 : index
      %441 = vector.load %arg3[%c0_132, %c0_133] : memref<8x32xf32, #tpu.memory_space<vmem>>, vector<8x32xf32>
      %c0_134 = arith.constant 0 : index
      %c0_135 = arith.constant 0 : index
      %442 = vector.load %arg10[%c0_134, %c0_135] : memref<8x32xf32, #tpu.memory_space<vmem>>, vector<8x32xf32>
      tpu.vector_store %arg10[%c0_134, %c0_135], %441 {strides = array<i32>} : memref<8x32xf32, #tpu.memory_space<vmem>>, vector<8x32xf32>,
    } else {
    }
    %c0 = arith.constant 0 : index
    %c0_1 = arith.constant 0 : index
    %3 = vector.load %arg5[%c0, %c0_1] : memref<48x128xf32, #tpu.memory_space<vmem>>, vector<48x128xf32>
    %c0_2 = arith.constant 0 : index
    %c0_3 = arith.constant 0 : index
    %4 = vector.load %arg6[%c0_2, %c0_3] : memref<1x128xf32, #tpu.memory_space<vmem>>, vector<1x128xf32>
    %c0_4 = arith.constant 0 : index
    %c0_5 = arith.constant 0 : index
    %5 = vector.load %arg7[%c0_4, %c0_5] : memref<32x8xf32, #tpu.memory_space<vmem>>, vector<32x8xf32>
    %c0_6 = arith.constant 0 : index
    %c0_7 = arith.constant 0 : index
    %6 = vector.load %arg8[%c0_6, %c0_7] : memref<1x8xf32, #tpu.memory_space<vmem>>, vector<1x8xf32>
    %c0_8 = arith.constant 0 : index
    %c0_9 = arith.constant 0 : index
    %7 = vector.load %arg10[%c0_8, %c0_9] : memref<8x32xf32, #tpu.memory_space<vmem>>, vector<8x32xf32>
    %c0_i32_10 = arith.constant 0 : i32
    %8 = arith.index_cast %c0_i32_10 : i32 to index
    %c0_11 = arith.constant 0 : index
    %c0_12 = arith.constant 0 : index
    %9 = vector.load %arg2[%8, %c0_11, %c0_12] : memref<12x8x16xf32, #tpu.memory_space<vmem>>, vector<1x8x16xf32>
    %10 = vector.shape_cast %9 : vector<1x8x16xf32> to vector<8x16xf32>
    %11 = tpu.concatenate %10, %7 in 1 : vector<8x16xf32>, vector<8x32xf32> -> vector<8x48xf32>
    %cst = arith.constant dense<0.000000e+00> : vector<8x128xf32>
    %12 = tpu.matmul %11, %3, %cst {dimension_numbers = #tpu.dot_dimension_numbers<[1], [0], [0], [1], [0, 0, 1, 1], [], []>} : vector<8x48xf32>, vector<48x128xf32>, vector<8x128xf32> -> vector<8x128xf32>
    %13 = vector.broadcast %4 : vector<1x128xf32> to vector<8x128xf32>
    %14 = arith.addf %12, %13 : vector<8x128xf32>
    %15 = vector.extract_strided_slice %14 {offsets = [0, 0], sizes = [8, 64], strides = [1, 1]} : vector<8x128xf32> to vector<8x64xf32>
    %16 = arith.negf %15 : vector<8x64xf32>
    %17 = math.exp %16 : vector<8x64xf32>
    %cst_13 = arith.constant 1.000000e+00 : f32
    %18 = vector.broadcast %cst_13 : f32 to vector<8x64xf32>
    %19 = arith.addf %18, %17 : vector<8x64xf32>
    %20 = arith.divf %18, %19 : vector<8x64xf32>
    %21 = vector.extract_strided_slice %20 {offsets = [0, 0], sizes = [8, 32], strides = [1, 1]} : vector<8x64xf32> to vector<8x32xf32>
    %22 = vector.extract_strided_slice %20 {offsets = [0, 32], sizes = [8, 32], strides = [1, 1]} : vector<8x64xf32> to vector<8x32xf32>
    %23 = vector.extract_strided_slice %14 {offsets = [0, 64], sizes = [8, 32], strides = [1, 1]} : vector<8x128xf32> to vector<8x32xf32>
    %24 = vector.extract_strided_slice %14 {offsets = [0, 96], sizes = [8, 32], strides = [1, 1]} : vector<8x128xf32> to vector<8x32xf32>
    %25 = arith.mulf %21, %24 : vector<8x32xf32>
    %26 = arith.addf %23, %25 : vector<8x32xf32>
    %27 = math.tanh %26 : vector<8x32xf32>
    %28 = arith.subf %7, %27 : vector<8x32xf32>
    %29 = arith.mulf %22, %28 : vector<8x32xf32>
    %30 = arith.addf %27, %29 : vector<8x32xf32>
    %cst_14 = arith.constant dense<0.000000e+00> : vector<8x8xf32>
    %31 = tpu.matmul %30, %5, %cst_14 {dimension_numbers = #tpu.dot_dimension_numbers<[1], [0], [0], [1], [0, 0, 1, 1], [], []>} : vector<8x32xf32>, vector<32x8xf32>, vector<8x8xf32> -> vector<8x8xf32>
    %32 = vector.broadcast %6 : vector<1x8xf32> to vector<8x8xf32>
    %33 = arith.addf %31, %32 : vector<8x8xf32>
    %34 = arith.index_cast %c0_i32_10 : i32 to index
    %c0_15 = arith.constant 0 : index
    %c0_16 = arith.constant 0 : index
    %35 = vector.load %arg9[%34, %c0_15, %c0_16] : memref<12x8x8xf32, #tpu.memory_space<vmem>>, vector<1x8x8xf32>
    %36 = vector.shape_cast %35 : vector<1x8x8xf32> to vector<8x8xf32>
    %37 = vector.shape_cast %33 : vector<8x8xf32> to vector<1x8x8xf32>
    tpu.vector_store %arg9[%34, %c0_15, %c0_16], %37 {strides = array<i32>} : memref<12x8x8xf32, #tpu.memory_space<vmem>>, vector<1x8x8xf32>,
    %38 = arith.index_cast %c0_i32_10 : i32 to index
    %c0_17 = arith.constant 0 : index
    %c0_18 = arith.constant 0 : index
    %39 = vector.load %arg4[%38, %c0_17, %c0_18] : memref<12x8x32xf32, #tpu.memory_space<vmem>>, vector<1x8x32xf32>
    %40 = vector.shape_cast %39 : vector<1x8x32xf32> to vector<8x32xf32>
    %cst_19 = arith.constant 5.000000e-02 : f32
    %41 = vector.broadcast %cst_19 : f32 to vector<8x32xf32>
    %42 = arith.mulf %41, %40 : vector<8x32xf32>
    %43 = arith.addf %30, %42 : vector<8x32xf32>
    %c1_i32 = arith.constant 1 : i32
    %44 = arith.index_cast %c1_i32 : i32 to index
    %c0_20 = arith.constant 0 : index
    %c0_21 = arith.constant 0 : index
    %45 = vector.load %arg2[%44, %c0_20, %c0_21] : memref<12x8x16xf32, #tpu.memory_space<vmem>>, vector<1x8x16xf32>
    %46 = vector.shape_cast %45 : vector<1x8x16xf32> to vector<8x16xf32>
    %47 = tpu.concatenate %46, %43 in 1 : vector<8x16xf32>, vector<8x32xf32> -> vector<8x48xf32>
    %cst_22 = arith.constant dense<0.000000e+00> : vector<8x128xf32>
    %48 = tpu.matmul %47, %3, %cst_22 {dimension_numbers = #tpu.dot_dimension_numbers<[1], [0], [0], [1], [0, 0, 1, 1], [], []>} : vector<8x48xf32>, vector<48x128xf32>, vector<8x128xf32> -> vector<8x128xf32>
    %49 = vector.broadcast %4 : vector<1x128xf32> to vector<8x128xf32>
    %50 = arith.addf %48, %49 : vector<8x128xf32>
    %51 = vector.extract_strided_slice %50 {offsets = [0, 0], sizes = [8, 64], strides = [1, 1]} : vector<8x128xf32> to vector<8x64xf32>
    %52 = arith.negf %51 : vector<8x64xf32>
    %53 = math.exp %52 : vector<8x64xf32>
    %cst_23 = arith.constant 1.000000e+00 : f32
    %54 = vector.broadcast %cst_23 : f32 to vector<8x64xf32>
    %55 = arith.addf %54, %53 : vector<8x64xf32>
    %56 = arith.divf %54, %55 : vector<8x64xf32>
    %57 = vector.extract_strided_slice %56 {offsets = [0, 0], sizes = [8, 32], strides = [1, 1]} : vector<8x64xf32> to vector<8x32xf32>
    %58 = vector.extract_strided_slice %56 {offsets = [0, 32], sizes = [8, 32], strides = [1, 1]} : vector<8x64xf32> to vector<8x32xf32>
    %59 = vector.extract_strided_slice %50 {offsets = [0, 64], sizes = [8, 32], strides = [1, 1]} : vector<8x128xf32> to vector<8x32xf32>
    %60 = vector.extract_strided_slice %50 {offsets = [0, 96], sizes = [8, 32], strides = [1, 1]} : vector<8x128xf32> to vector<8x32xf32>
    %61 = arith.mulf %57, %60 : vector<8x32xf32>
    %62 = arith.addf %59, %61 : vector<8x32xf32>
    %63 = math.tanh %62 : vector<8x32xf32>
    %64 = arith.subf %43, %63 : vector<8x32xf32>
    %65 = arith.mulf %58, %64 : vector<8x32xf32>
    %66 = arith.addf %63, %65 : vector<8x32xf32>
    %cst_24 = arith.constant dense<0.000000e+00> : vector<8x8xf32>
    %67 = tpu.matmul %66, %5, %cst_24 {dimension_numbers = #tpu.dot_dimension_numbers<[1], [0], [0], [1], [0, 0, 1, 1], [], []>} : vector<8x32xf32>, vector<32x8xf32>, vector<8x8xf32> -> vector<8x8xf32>
    %68 = vector.broadcast %6 : vector<1x8xf32> to vector<8x8xf32>
    %69 = arith.addf %67, %68 : vector<8x8xf32>
    %70 = arith.index_cast %c1_i32 : i32 to index
    %c0_25 = arith.constant 0 : index
    %c0_26 = arith.constant 0 : index
    %71 = vector.load %arg9[%70, %c0_25, %c0_26] : memref<12x8x8xf32, #tpu.memory_space<vmem>>, vector<1x8x8xf32>
    %72 = vector.shape_cast %71 : vector<1x8x8xf32> to vector<8x8xf32>
    %73 = vector.shape_cast %69 : vector<8x8xf32> to vector<1x8x8xf32>
    tpu.vector_store %arg9[%70, %c0_25, %c0_26], %73 {strides = array<i32>} : memref<12x8x8xf32, #tpu.memory_space<vmem>>, vector<1x8x8xf32>,
    %74 = arith.index_cast %c1_i32 : i32 to index
    %c0_27 = arith.constant 0 : index
    %c0_28 = arith.constant 0 : index
    %75 = vector.load %arg4[%74, %c0_27, %c0_28] : memref<12x8x32xf32, #tpu.memory_space<vmem>>, vector<1x8x32xf32>
    %76 = vector.shape_cast %75 : vector<1x8x32xf32> to vector<8x32xf32>
    %cst_29 = arith.constant 5.000000e-02 : f32
    %77 = vector.broadcast %cst_29 : f32 to vector<8x32xf32>
    %78 = arith.mulf %77, %76 : vector<8x32xf32>
    %79 = arith.addf %66, %78 : vector<8x32xf32>
    %c2_i32 = arith.constant 2 : i32
    %80 = arith.index_cast %c2_i32 : i32 to index
    %c0_30 = arith.constant 0 : index
    %c0_31 = arith.constant 0 : index
    %81 = vector.load %arg2[%80, %c0_30, %c0_31] : memref<12x8x16xf32, #tpu.memory_space<vmem>>, vector<1x8x16xf32>
    %82 = vector.shape_cast %81 : vector<1x8x16xf32> to vector<8x16xf32>
    %83 = tpu.concatenate %82, %79 in 1 : vector<8x16xf32>, vector<8x32xf32> -> vector<8x48xf32>
    %cst_32 = arith.constant dense<0.000000e+00> : vector<8x128xf32>
    %84 = tpu.matmul %83, %3, %cst_32 {dimension_numbers = #tpu.dot_dimension_numbers<[1], [0], [0], [1], [0, 0, 1, 1], [], []>} : vector<8x48xf32>, vector<48x128xf32>, vector<8x128xf32> -> vector<8x128xf32>
    %85 = vector.broadcast %4 : vector<1x128xf32> to vector<8x128xf32>
    %86 = arith.addf %84, %85 : vector<8x128xf32>
    %87 = vector.extract_strided_slice %86 {offsets = [0, 0], sizes = [8, 64], strides = [1, 1]} : vector<8x128xf32> to vector<8x64xf32>
    %88 = arith.negf %87 : vector<8x64xf32>
    %89 = math.exp %88 : vector<8x64xf32>
    %cst_33 = arith.constant 1.000000e+00 : f32
    %90 = vector.broadcast %cst_33 : f32 to vector<8x64xf32>
    %91 = arith.addf %90, %89 : vector<8x64xf32>
    %92 = arith.divf %90, %91 : vector<8x64xf32>
    %93 = vector.extract_strided_slice %92 {offsets = [0, 0], sizes = [8, 32], strides = [1, 1]} : vector<8x64xf32> to vector<8x32xf32>
    %94 = vector.extract_strided_slice %92 {offsets = [0, 32], sizes = [8, 32], strides = [1, 1]} : vector<8x64xf32> to vector<8x32xf32>
    %95 = vector.extract_strided_slice %86 {offsets = [0, 64], sizes = [8, 32], strides = [1, 1]} : vector<8x128xf32> to vector<8x32xf32>
    %96 = vector.extract_strided_slice %86 {offsets = [0, 96], sizes = [8, 32], strides = [1, 1]} : vector<8x128xf32> to vector<8x32xf32>
    %97 = arith.mulf %93, %96 : vector<8x32xf32>
    %98 = arith.addf %95, %97 : vector<8x32xf32>
    %99 = math.tanh %98 : vector<8x32xf32>
    %100 = arith.subf %79, %99 : vector<8x32xf32>
    %101 = arith.mulf %94, %100 : vector<8x32xf32>
    %102 = arith.addf %99, %101 : vector<8x32xf32>
    %cst_34 = arith.constant dense<0.000000e+00> : vector<8x8xf32>
    %103 = tpu.matmul %102, %5, %cst_34 {dimension_numbers = #tpu.dot_dimension_numbers<[1], [0], [0], [1], [0, 0, 1, 1], [], []>} : vector<8x32xf32>, vector<32x8xf32>, vector<8x8xf32> -> vector<8x8xf32>
    %104 = vector.broadcast %6 : vector<1x8xf32> to vector<8x8xf32>
    %105 = arith.addf %103, %104 : vector<8x8xf32>
    %106 = arith.index_cast %c2_i32 : i32 to index
    %c0_35 = arith.constant 0 : index
    %c0_36 = arith.constant 0 : index
    %107 = vector.load %arg9[%106, %c0_35, %c0_36] : memref<12x8x8xf32, #tpu.memory_space<vmem>>, vector<1x8x8xf32>
    %108 = vector.shape_cast %107 : vector<1x8x8xf32> to vector<8x8xf32>
    %109 = vector.shape_cast %105 : vector<8x8xf32> to vector<1x8x8xf32>
    tpu.vector_store %arg9[%106, %c0_35, %c0_36], %109 {strides = array<i32>} : memref<12x8x8xf32, #tpu.memory_space<vmem>>, vector<1x8x8xf32>,
    %110 = arith.index_cast %c2_i32 : i32 to index
    %c0_37 = arith.constant 0 : index
    %c0_38 = arith.constant 0 : index
    %111 = vector.load %arg4[%110, %c0_37, %c0_38] : memref<12x8x32xf32, #tpu.memory_space<vmem>>, vector<1x8x32xf32>
    %112 = vector.shape_cast %111 : vector<1x8x32xf32> to vector<8x32xf32>
    %cst_39 = arith.constant 5.000000e-02 : f32
    %113 = vector.broadcast %cst_39 : f32 to vector<8x32xf32>
    %114 = arith.mulf %113, %112 : vector<8x32xf32>
    %115 = arith.addf %102, %114 : vector<8x32xf32>
    %c3_i32 = arith.constant 3 : i32
    %116 = arith.index_cast %c3_i32 : i32 to index
    %c0_40 = arith.constant 0 : index
    %c0_41 = arith.constant 0 : index
    %117 = vector.load %arg2[%116, %c0_40, %c0_41] : memref<12x8x16xf32, #tpu.memory_space<vmem>>, vector<1x8x16xf32>
    %118 = vector.shape_cast %117 : vector<1x8x16xf32> to vector<8x16xf32>
    %119 = tpu.concatenate %118, %115 in 1 : vector<8x16xf32>, vector<8x32xf32> -> vector<8x48xf32>
    %cst_42 = arith.constant dense<0.000000e+00> : vector<8x128xf32>
    %120 = tpu.matmul %119, %3, %cst_42 {dimension_numbers = #tpu.dot_dimension_numbers<[1], [0], [0], [1], [0, 0, 1, 1], [], []>} : vector<8x48xf32>, vector<48x128xf32>, vector<8x128xf32> -> vector<8x128xf32>
    %121 = vector.broadcast %4 : vector<1x128xf32> to vector<8x128xf32>
    %122 = arith.addf %120, %121 : vector<8x128xf32>
    %123 = vector.extract_strided_slice %122 {offsets = [0, 0], sizes = [8, 64], strides = [1, 1]} : vector<8x128xf32> to vector<8x64xf32>
    %124 = arith.negf %123 : vector<8x64xf32>
    %125 = math.exp %124 : vector<8x64xf32>
    %cst_43 = arith.constant 1.000000e+00 : f32
    %126 = vector.broadcast %cst_43 : f32 to vector<8x64xf32>
    %127 = arith.addf %126, %125 : vector<8x64xf32>
    %128 = arith.divf %126, %127 : vector<8x64xf32>
    %129 = vector.extract_strided_slice %128 {offsets = [0, 0], sizes = [8, 32], strides = [1, 1]} : vector<8x64xf32> to vector<8x32xf32>
    %130 = vector.extract_strided_slice %128 {offsets = [0, 32], sizes = [8, 32], strides = [1, 1]} : vector<8x64xf32> to vector<8x32xf32>
    %131 = vector.extract_strided_slice %122 {offsets = [0, 64], sizes = [8, 32], strides = [1, 1]} : vector<8x128xf32> to vector<8x32xf32>
    %132 = vector.extract_strided_slice %122 {offsets = [0, 96], sizes = [8, 32], strides = [1, 1]} : vector<8x128xf32> to vector<8x32xf32>
    %133 = arith.mulf %129, %132 : vector<8x32xf32>
    %134 = arith.addf %131, %133 : vector<8x32xf32>
    %135 = math.tanh %134 : vector<8x32xf32>
    %136 = arith.subf %115, %135 : vector<8x32xf32>
    %137 = arith.mulf %130, %136 : vector<8x32xf32>
    %138 = arith.addf %135, %137 : vector<8x32xf32>
    %cst_44 = arith.constant dense<0.000000e+00> : vector<8x8xf32>
    %139 = tpu.matmul %138, %5, %cst_44 {dimension_numbers = #tpu.dot_dimension_numbers<[1], [0], [0], [1], [0, 0, 1, 1], [], []>} : vector<8x32xf32>, vector<32x8xf32>, vector<8x8xf32> -> vector<8x8xf32>
    %140 = vector.broadcast %6 : vector<1x8xf32> to vector<8x8xf32>
    %141 = arith.addf %139, %140 : vector<8x8xf32>
    %142 = arith.index_cast %c3_i32 : i32 to index
    %c0_45 = arith.constant 0 : index
    %c0_46 = arith.constant 0 : index
    %143 = vector.load %arg9[%142, %c0_45, %c0_46] : memref<12x8x8xf32, #tpu.memory_space<vmem>>, vector<1x8x8xf32>
    %144 = vector.shape_cast %143 : vector<1x8x8xf32> to vector<8x8xf32>
    %145 = vector.shape_cast %141 : vector<8x8xf32> to vector<1x8x8xf32>
    tpu.vector_store %arg9[%142, %c0_45, %c0_46], %145 {strides = array<i32>} : memref<12x8x8xf32, #tpu.memory_space<vmem>>, vector<1x8x8xf32>,
    %146 = arith.index_cast %c3_i32 : i32 to index
    %c0_47 = arith.constant 0 : index
    %c0_48 = arith.constant 0 : index
    %147 = vector.load %arg4[%146, %c0_47, %c0_48] : memref<12x8x32xf32, #tpu.memory_space<vmem>>, vector<1x8x32xf32>
    %148 = vector.shape_cast %147 : vector<1x8x32xf32> to vector<8x32xf32>
    %cst_49 = arith.constant 5.000000e-02 : f32
    %149 = vector.broadcast %cst_49 : f32 to vector<8x32xf32>
    %150 = arith.mulf %149, %148 : vector<8x32xf32>
    %151 = arith.addf %138, %150 : vector<8x32xf32>
    %c4_i32 = arith.constant 4 : i32
    %152 = arith.index_cast %c4_i32 : i32 to index
    %c0_50 = arith.constant 0 : index
    %c0_51 = arith.constant 0 : index
    %153 = vector.load %arg2[%152, %c0_50, %c0_51] : memref<12x8x16xf32, #tpu.memory_space<vmem>>, vector<1x8x16xf32>
    %154 = vector.shape_cast %153 : vector<1x8x16xf32> to vector<8x16xf32>
    %155 = tpu.concatenate %154, %151 in 1 : vector<8x16xf32>, vector<8x32xf32> -> vector<8x48xf32>
    %cst_52 = arith.constant dense<0.000000e+00> : vector<8x128xf32>
    %156 = tpu.matmul %155, %3, %cst_52 {dimension_numbers = #tpu.dot_dimension_numbers<[1], [0], [0], [1], [0, 0, 1, 1], [], []>} : vector<8x48xf32>, vector<48x128xf32>, vector<8x128xf32> -> vector<8x128xf32>
    %157 = vector.broadcast %4 : vector<1x128xf32> to vector<8x128xf32>
    %158 = arith.addf %156, %157 : vector<8x128xf32>
    %159 = vector.extract_strided_slice %158 {offsets = [0, 0], sizes = [8, 64], strides = [1, 1]} : vector<8x128xf32> to vector<8x64xf32>
    %160 = arith.negf %159 : vector<8x64xf32>
    %161 = math.exp %160 : vector<8x64xf32>
    %cst_53 = arith.constant 1.000000e+00 : f32
    %162 = vector.broadcast %cst_53 : f32 to vector<8x64xf32>
    %163 = arith.addf %162, %161 : vector<8x64xf32>
    %164 = arith.divf %162, %163 : vector<8x64xf32>
    %165 = vector.extract_strided_slice %164 {offsets = [0, 0], sizes = [8, 32], strides = [1, 1]} : vector<8x64xf32> to vector<8x32xf32>
    %166 = vector.extract_strided_slice %164 {offsets = [0, 32], sizes = [8, 32], strides = [1, 1]} : vector<8x64xf32> to vector<8x32xf32>
    %167 = vector.extract_strided_slice %158 {offsets = [0, 64], sizes = [8, 32], strides = [1, 1]} : vector<8x128xf32> to vector<8x32xf32>
    %168 = vector.extract_strided_slice %158 {offsets = [0, 96], sizes = [8, 32], strides = [1, 1]} : vector<8x128xf32> to vector<8x32xf32>
    %169 = arith.mulf %165, %168 : vector<8x32xf32>
    %170 = arith.addf %167, %169 : vector<8x32xf32>
    %171 = math.tanh %170 : vector<8x32xf32>
    %172 = arith.subf %151, %171 : vector<8x32xf32>
    %173 = arith.mulf %166, %172 : vector<8x32xf32>
    %174 = arith.addf %171, %173 : vector<8x32xf32>
    %cst_54 = arith.constant dense<0.000000e+00> : vector<8x8xf32>
    %175 = tpu.matmul %174, %5, %cst_54 {dimension_numbers = #tpu.dot_dimension_numbers<[1], [0], [0], [1], [0, 0, 1, 1], [], []>} : vector<8x32xf32>, vector<32x8xf32>, vector<8x8xf32> -> vector<8x8xf32>
    %176 = vector.broadcast %6 : vector<1x8xf32> to vector<8x8xf32>
    %177 = arith.addf %175, %176 : vector<8x8xf32>
    %178 = arith.index_cast %c4_i32 : i32 to index
    %c0_55 = arith.constant 0 : index
    %c0_56 = arith.constant 0 : index
    %179 = vector.load %arg9[%178, %c0_55, %c0_56] : memref<12x8x8xf32, #tpu.memory_space<vmem>>, vector<1x8x8xf32>
    %180 = vector.shape_cast %179 : vector<1x8x8xf32> to vector<8x8xf32>
    %181 = vector.shape_cast %177 : vector<8x8xf32> to vector<1x8x8xf32>
    tpu.vector_store %arg9[%178, %c0_55, %c0_56], %181 {strides = array<i32>} : memref<12x8x8xf32, #tpu.memory_space<vmem>>, vector<1x8x8xf32>,
    %182 = arith.index_cast %c4_i32 : i32 to index
    %c0_57 = arith.constant 0 : index
    %c0_58 = arith.constant 0 : index
    %183 = vector.load %arg4[%182, %c0_57, %c0_58] : memref<12x8x32xf32, #tpu.memory_space<vmem>>, vector<1x8x32xf32>
    %184 = vector.shape_cast %183 : vector<1x8x32xf32> to vector<8x32xf32>
    %cst_59 = arith.constant 5.000000e-02 : f32
    %185 = vector.broadcast %cst_59 : f32 to vector<8x32xf32>
    %186 = arith.mulf %185, %184 : vector<8x32xf32>
    %187 = arith.addf %174, %186 : vector<8x32xf32>
    %c5_i32 = arith.constant 5 : i32
    %188 = arith.index_cast %c5_i32 : i32 to index
    %c0_60 = arith.constant 0 : index
    %c0_61 = arith.constant 0 : index
    %189 = vector.load %arg2[%188, %c0_60, %c0_61] : memref<12x8x16xf32, #tpu.memory_space<vmem>>, vector<1x8x16xf32>
    %190 = vector.shape_cast %189 : vector<1x8x16xf32> to vector<8x16xf32>
    %191 = tpu.concatenate %190, %187 in 1 : vector<8x16xf32>, vector<8x32xf32> -> vector<8x48xf32>
    %cst_62 = arith.constant dense<0.000000e+00> : vector<8x128xf32>
    %192 = tpu.matmul %191, %3, %cst_62 {dimension_numbers = #tpu.dot_dimension_numbers<[1], [0], [0], [1], [0, 0, 1, 1], [], []>} : vector<8x48xf32>, vector<48x128xf32>, vector<8x128xf32> -> vector<8x128xf32>
    %193 = vector.broadcast %4 : vector<1x128xf32> to vector<8x128xf32>
    %194 = arith.addf %192, %193 : vector<8x128xf32>
    %195 = vector.extract_strided_slice %194 {offsets = [0, 0], sizes = [8, 64], strides = [1, 1]} : vector<8x128xf32> to vector<8x64xf32>
    %196 = arith.negf %195 : vector<8x64xf32>
    %197 = math.exp %196 : vector<8x64xf32>
    %cst_63 = arith.constant 1.000000e+00 : f32
    %198 = vector.broadcast %cst_63 : f32 to vector<8x64xf32>
    %199 = arith.addf %198, %197 : vector<8x64xf32>
    %200 = arith.divf %198, %199 : vector<8x64xf32>
    %201 = vector.extract_strided_slice %200 {offsets = [0, 0], sizes = [8, 32], strides = [1, 1]} : vector<8x64xf32> to vector<8x32xf32>
    %202 = vector.extract_strided_slice %200 {offsets = [0, 32], sizes = [8, 32], strides = [1, 1]} : vector<8x64xf32> to vector<8x32xf32>
    %203 = vector.extract_strided_slice %194 {offsets = [0, 64], sizes = [8, 32], strides = [1, 1]} : vector<8x128xf32> to vector<8x32xf32>
    %204 = vector.extract_strided_slice %194 {offsets = [0, 96], sizes = [8, 32], strides = [1, 1]} : vector<8x128xf32> to vector<8x32xf32>
    %205 = arith.mulf %201, %204 : vector<8x32xf32>
    %206 = arith.addf %203, %205 : vector<8x32xf32>
    %207 = math.tanh %206 : vector<8x32xf32>
    %208 = arith.subf %187, %207 : vector<8x32xf32>
    %209 = arith.mulf %202, %208 : vector<8x32xf32>
    %210 = arith.addf %207, %209 : vector<8x32xf32>
    %cst_64 = arith.constant dense<0.000000e+00> : vector<8x8xf32>
    %211 = tpu.matmul %210, %5, %cst_64 {dimension_numbers = #tpu.dot_dimension_numbers<[1], [0], [0], [1], [0, 0, 1, 1], [], []>} : vector<8x32xf32>, vector<32x8xf32>, vector<8x8xf32> -> vector<8x8xf32>
    %212 = vector.broadcast %6 : vector<1x8xf32> to vector<8x8xf32>
    %213 = arith.addf %211, %212 : vector<8x8xf32>
    %214 = arith.index_cast %c5_i32 : i32 to index
    %c0_65 = arith.constant 0 : index
    %c0_66 = arith.constant 0 : index
    %215 = vector.load %arg9[%214, %c0_65, %c0_66] : memref<12x8x8xf32, #tpu.memory_space<vmem>>, vector<1x8x8xf32>
    %216 = vector.shape_cast %215 : vector<1x8x8xf32> to vector<8x8xf32>
    %217 = vector.shape_cast %213 : vector<8x8xf32> to vector<1x8x8xf32>
    tpu.vector_store %arg9[%214, %c0_65, %c0_66], %217 {strides = array<i32>} : memref<12x8x8xf32, #tpu.memory_space<vmem>>, vector<1x8x8xf32>,
    %218 = arith.index_cast %c5_i32 : i32 to index
    %c0_67 = arith.constant 0 : index
    %c0_68 = arith.constant 0 : index
    %219 = vector.load %arg4[%218, %c0_67, %c0_68] : memref<12x8x32xf32, #tpu.memory_space<vmem>>, vector<1x8x32xf32>
    %220 = vector.shape_cast %219 : vector<1x8x32xf32> to vector<8x32xf32>
    %cst_69 = arith.constant 5.000000e-02 : f32
    %221 = vector.broadcast %cst_69 : f32 to vector<8x32xf32>
    %222 = arith.mulf %221, %220 : vector<8x32xf32>
    %223 = arith.addf %210, %222 : vector<8x32xf32>
    %c6_i32 = arith.constant 6 : i32
    %224 = arith.index_cast %c6_i32 : i32 to index
    %c0_70 = arith.constant 0 : index
    %c0_71 = arith.constant 0 : index
    %225 = vector.load %arg2[%224, %c0_70, %c0_71] : memref<12x8x16xf32, #tpu.memory_space<vmem>>, vector<1x8x16xf32>
    %226 = vector.shape_cast %225 : vector<1x8x16xf32> to vector<8x16xf32>
    %227 = tpu.concatenate %226, %223 in 1 : vector<8x16xf32>, vector<8x32xf32> -> vector<8x48xf32>
    %cst_72 = arith.constant dense<0.000000e+00> : vector<8x128xf32>
    %228 = tpu.matmul %227, %3, %cst_72 {dimension_numbers = #tpu.dot_dimension_numbers<[1], [0], [0], [1], [0, 0, 1, 1], [], []>} : vector<8x48xf32>, vector<48x128xf32>, vector<8x128xf32> -> vector<8x128xf32>
    %229 = vector.broadcast %4 : vector<1x128xf32> to vector<8x128xf32>
    %230 = arith.addf %228, %229 : vector<8x128xf32>
    %231 = vector.extract_strided_slice %230 {offsets = [0, 0], sizes = [8, 64], strides = [1, 1]} : vector<8x128xf32> to vector<8x64xf32>
    %232 = arith.negf %231 : vector<8x64xf32>
    %233 = math.exp %232 : vector<8x64xf32>
    %cst_73 = arith.constant 1.000000e+00 : f32
    %234 = vector.broadcast %cst_73 : f32 to vector<8x64xf32>
    %235 = arith.addf %234, %233 : vector<8x64xf32>
    %236 = arith.divf %234, %235 : vector<8x64xf32>
    %237 = vector.extract_strided_slice %236 {offsets = [0, 0], sizes = [8, 32], strides = [1, 1]} : vector<8x64xf32> to vector<8x32xf32>
    %238 = vector.extract_strided_slice %236 {offsets = [0, 32], sizes = [8, 32], strides = [1, 1]} : vector<8x64xf32> to vector<8x32xf32>
    %239 = vector.extract_strided_slice %230 {offsets = [0, 64], sizes = [8, 32], strides = [1, 1]} : vector<8x128xf32> to vector<8x32xf32>
    %240 = vector.extract_strided_slice %230 {offsets = [0, 96], sizes = [8, 32], strides = [1, 1]} : vector<8x128xf32> to vector<8x32xf32>
    %241 = arith.mulf %237, %240 : vector<8x32xf32>
    %242 = arith.addf %239, %241 : vector<8x32xf32>
    %243 = math.tanh %242 : vector<8x32xf32>
    %244 = arith.subf %223, %243 : vector<8x32xf32>
    %245 = arith.mulf %238, %244 : vector<8x32xf32>
    %246 = arith.addf %243, %245 : vector<8x32xf32>
    %cst_74 = arith.constant dense<0.000000e+00> : vector<8x8xf32>
    %247 = tpu.matmul %246, %5, %cst_74 {dimension_numbers = #tpu.dot_dimension_numbers<[1], [0], [0], [1], [0, 0, 1, 1], [], []>} : vector<8x32xf32>, vector<32x8xf32>, vector<8x8xf32> -> vector<8x8xf32>
    %248 = vector.broadcast %6 : vector<1x8xf32> to vector<8x8xf32>
    %249 = arith.addf %247, %248 : vector<8x8xf32>
    %250 = arith.index_cast %c6_i32 : i32 to index
    %c0_75 = arith.constant 0 : index
    %c0_76 = arith.constant 0 : index
    %251 = vector.load %arg9[%250, %c0_75, %c0_76] : memref<12x8x8xf32, #tpu.memory_space<vmem>>, vector<1x8x8xf32>
    %252 = vector.shape_cast %251 : vector<1x8x8xf32> to vector<8x8xf32>
    %253 = vector.shape_cast %249 : vector<8x8xf32> to vector<1x8x8xf32>
    tpu.vector_store %arg9[%250, %c0_75, %c0_76], %253 {strides = array<i32>} : memref<12x8x8xf32, #tpu.memory_space<vmem>>, vector<1x8x8xf32>,
    %254 = arith.index_cast %c6_i32 : i32 to index
    %c0_77 = arith.constant 0 : index
    %c0_78 = arith.constant 0 : index
    %255 = vector.load %arg4[%254, %c0_77, %c0_78] : memref<12x8x32xf32, #tpu.memory_space<vmem>>, vector<1x8x32xf32>
    %256 = vector.shape_cast %255 : vector<1x8x32xf32> to vector<8x32xf32>
    %cst_79 = arith.constant 5.000000e-02 : f32
    %257 = vector.broadcast %cst_79 : f32 to vector<8x32xf32>
    %258 = arith.mulf %257, %256 : vector<8x32xf32>
    %259 = arith.addf %246, %258 : vector<8x32xf32>
    %c7_i32 = arith.constant 7 : i32
    %260 = arith.index_cast %c7_i32 : i32 to index
    %c0_80 = arith.constant 0 : index
    %c0_81 = arith.constant 0 : index
    %261 = vector.load %arg2[%260, %c0_80, %c0_81] : memref<12x8x16xf32, #tpu.memory_space<vmem>>, vector<1x8x16xf32>
    %262 = vector.shape_cast %261 : vector<1x8x16xf32> to vector<8x16xf32>
    %263 = tpu.concatenate %262, %259 in 1 : vector<8x16xf32>, vector<8x32xf32> -> vector<8x48xf32>
    %cst_82 = arith.constant dense<0.000000e+00> : vector<8x128xf32>
    %264 = tpu.matmul %263, %3, %cst_82 {dimension_numbers = #tpu.dot_dimension_numbers<[1], [0], [0], [1], [0, 0, 1, 1], [], []>} : vector<8x48xf32>, vector<48x128xf32>, vector<8x128xf32> -> vector<8x128xf32>
    %265 = vector.broadcast %4 : vector<1x128xf32> to vector<8x128xf32>
    %266 = arith.addf %264, %265 : vector<8x128xf32>
    %267 = vector.extract_strided_slice %266 {offsets = [0, 0], sizes = [8, 64], strides = [1, 1]} : vector<8x128xf32> to vector<8x64xf32>
    %268 = arith.negf %267 : vector<8x64xf32>
    %269 = math.exp %268 : vector<8x64xf32>
    %cst_83 = arith.constant 1.000000e+00 : f32
    %270 = vector.broadcast %cst_83 : f32 to vector<8x64xf32>
    %271 = arith.addf %270, %269 : vector<8x64xf32>
    %272 = arith.divf %270, %271 : vector<8x64xf32>
    %273 = vector.extract_strided_slice %272 {offsets = [0, 0], sizes = [8, 32], strides = [1, 1]} : vector<8x64xf32> to vector<8x32xf32>
    %274 = vector.extract_strided_slice %272 {offsets = [0, 32], sizes = [8, 32], strides = [1, 1]} : vector<8x64xf32> to vector<8x32xf32>
    %275 = vector.extract_strided_slice %266 {offsets = [0, 64], sizes = [8, 32], strides = [1, 1]} : vector<8x128xf32> to vector<8x32xf32>
    %276 = vector.extract_strided_slice %266 {offsets = [0, 96], sizes = [8, 32], strides = [1, 1]} : vector<8x128xf32> to vector<8x32xf32>
    %277 = arith.mulf %273, %276 : vector<8x32xf32>
    %278 = arith.addf %275, %277 : vector<8x32xf32>
    %279 = math.tanh %278 : vector<8x32xf32>
    %280 = arith.subf %259, %279 : vector<8x32xf32>
    %281 = arith.mulf %274, %280 : vector<8x32xf32>
    %282 = arith.addf %279, %281 : vector<8x32xf32>
    %cst_84 = arith.constant dense<0.000000e+00> : vector<8x8xf32>
    %283 = tpu.matmul %282, %5, %cst_84 {dimension_numbers = #tpu.dot_dimension_numbers<[1], [0], [0], [1], [0, 0, 1, 1], [], []>} : vector<8x32xf32>, vector<32x8xf32>, vector<8x8xf32> -> vector<8x8xf32>
    %284 = vector.broadcast %6 : vector<1x8xf32> to vector<8x8xf32>
    %285 = arith.addf %283, %284 : vector<8x8xf32>
    %286 = arith.index_cast %c7_i32 : i32 to index
    %c0_85 = arith.constant 0 : index
    %c0_86 = arith.constant 0 : index
    %287 = vector.load %arg9[%286, %c0_85, %c0_86] : memref<12x8x8xf32, #tpu.memory_space<vmem>>, vector<1x8x8xf32>
    %288 = vector.shape_cast %287 : vector<1x8x8xf32> to vector<8x8xf32>
    %289 = vector.shape_cast %285 : vector<8x8xf32> to vector<1x8x8xf32>
    tpu.vector_store %arg9[%286, %c0_85, %c0_86], %289 {strides = array<i32>} : memref<12x8x8xf32, #tpu.memory_space<vmem>>, vector<1x8x8xf32>,
    %290 = arith.index_cast %c7_i32 : i32 to index
    %c0_87 = arith.constant 0 : index
    %c0_88 = arith.constant 0 : index
    %291 = vector.load %arg4[%290, %c0_87, %c0_88] : memref<12x8x32xf32, #tpu.memory_space<vmem>>, vector<1x8x32xf32>
    %292 = vector.shape_cast %291 : vector<1x8x32xf32> to vector<8x32xf32>
    %cst_89 = arith.constant 5.000000e-02 : f32
    %293 = vector.broadcast %cst_89 : f32 to vector<8x32xf32>
    %294 = arith.mulf %293, %292 : vector<8x32xf32>
    %295 = arith.addf %282, %294 : vector<8x32xf32>
    %c8_i32 = arith.constant 8 : i32
    %296 = arith.index_cast %c8_i32 : i32 to index
    %c0_90 = arith.constant 0 : index
    %c0_91 = arith.constant 0 : index
    %297 = vector.load %arg2[%296, %c0_90, %c0_91] : memref<12x8x16xf32, #tpu.memory_space<vmem>>, vector<1x8x16xf32>
    %298 = vector.shape_cast %297 : vector<1x8x16xf32> to vector<8x16xf32>
    %299 = tpu.concatenate %298, %295 in 1 : vector<8x16xf32>, vector<8x32xf32> -> vector<8x48xf32>
    %cst_92 = arith.constant dense<0.000000e+00> : vector<8x128xf32>
    %300 = tpu.matmul %299, %3, %cst_92 {dimension_numbers = #tpu.dot_dimension_numbers<[1], [0], [0], [1], [0, 0, 1, 1], [], []>} : vector<8x48xf32>, vector<48x128xf32>, vector<8x128xf32> -> vector<8x128xf32>
    %301 = vector.broadcast %4 : vector<1x128xf32> to vector<8x128xf32>
    %302 = arith.addf %300, %301 : vector<8x128xf32>
    %303 = vector.extract_strided_slice %302 {offsets = [0, 0], sizes = [8, 64], strides = [1, 1]} : vector<8x128xf32> to vector<8x64xf32>
    %304 = arith.negf %303 : vector<8x64xf32>
    %305 = math.exp %304 : vector<8x64xf32>
    %cst_93 = arith.constant 1.000000e+00 : f32
    %306 = vector.broadcast %cst_93 : f32 to vector<8x64xf32>
    %307 = arith.addf %306, %305 : vector<8x64xf32>
    %308 = arith.divf %306, %307 : vector<8x64xf32>
    %309 = vector.extract_strided_slice %308 {offsets = [0, 0], sizes = [8, 32], strides = [1, 1]} : vector<8x64xf32> to vector<8x32xf32>
    %310 = vector.extract_strided_slice %308 {offsets = [0, 32], sizes = [8, 32], strides = [1, 1]} : vector<8x64xf32> to vector<8x32xf32>
    %311 = vector.extract_strided_slice %302 {offsets = [0, 64], sizes = [8, 32], strides = [1, 1]} : vector<8x128xf32> to vector<8x32xf32>
    %312 = vector.extract_strided_slice %302 {offsets = [0, 96], sizes = [8, 32], strides = [1, 1]} : vector<8x128xf32> to vector<8x32xf32>
    %313 = arith.mulf %309, %312 : vector<8x32xf32>
    %314 = arith.addf %311, %313 : vector<8x32xf32>
    %315 = math.tanh %314 : vector<8x32xf32>
    %316 = arith.subf %295, %315 : vector<8x32xf32>
    %317 = arith.mulf %310, %316 : vector<8x32xf32>
    %318 = arith.addf %315, %317 : vector<8x32xf32>
    %cst_94 = arith.constant dense<0.000000e+00> : vector<8x8xf32>
    %319 = tpu.matmul %318, %5, %cst_94 {dimension_numbers = #tpu.dot_dimension_numbers<[1], [0], [0], [1], [0, 0, 1, 1], [], []>} : vector<8x32xf32>, vector<32x8xf32>, vector<8x8xf32> -> vector<8x8xf32>
    %320 = vector.broadcast %6 : vector<1x8xf32> to vector<8x8xf32>
    %321 = arith.addf %319, %320 : vector<8x8xf32>
    %322 = arith.index_cast %c8_i32 : i32 to index
    %c0_95 = arith.constant 0 : index
    %c0_96 = arith.constant 0 : index
    %323 = vector.load %arg9[%322, %c0_95, %c0_96] : memref<12x8x8xf32, #tpu.memory_space<vmem>>, vector<1x8x8xf32>
    %324 = vector.shape_cast %323 : vector<1x8x8xf32> to vector<8x8xf32>
    %325 = vector.shape_cast %321 : vector<8x8xf32> to vector<1x8x8xf32>
    tpu.vector_store %arg9[%322, %c0_95, %c0_96], %325 {strides = array<i32>} : memref<12x8x8xf32, #tpu.memory_space<vmem>>, vector<1x8x8xf32>,
    %326 = arith.index_cast %c8_i32 : i32 to index
    %c0_97 = arith.constant 0 : index
    %c0_98 = arith.constant 0 : index
    %327 = vector.load %arg4[%326, %c0_97, %c0_98] : memref<12x8x32xf32, #tpu.memory_space<vmem>>, vector<1x8x32xf32>
    %328 = vector.shape_cast %327 : vector<1x8x32xf32> to vector<8x32xf32>
    %cst_99 = arith.constant 5.000000e-02 : f32
    %329 = vector.broadcast %cst_99 : f32 to vector<8x32xf32>
    %330 = arith.mulf %329, %328 : vector<8x32xf32>
    %331 = arith.addf %318, %330 : vector<8x32xf32>
    %c9_i32 = arith.constant 9 : i32
    %332 = arith.index_cast %c9_i32 : i32 to index
    %c0_100 = arith.constant 0 : index
    %c0_101 = arith.constant 0 : index
    %333 = vector.load %arg2[%332, %c0_100, %c0_101] : memref<12x8x16xf32, #tpu.memory_space<vmem>>, vector<1x8x16xf32>
    %334 = vector.shape_cast %333 : vector<1x8x16xf32> to vector<8x16xf32>
    %335 = tpu.concatenate %334, %331 in 1 : vector<8x16xf32>, vector<8x32xf32> -> vector<8x48xf32>
    %cst_102 = arith.constant dense<0.000000e+00> : vector<8x128xf32>
    %336 = tpu.matmul %335, %3, %cst_102 {dimension_numbers = #tpu.dot_dimension_numbers<[1], [0], [0], [1], [0, 0, 1, 1], [], []>} : vector<8x48xf32>, vector<48x128xf32>, vector<8x128xf32> -> vector<8x128xf32>
    %337 = vector.broadcast %4 : vector<1x128xf32> to vector<8x128xf32>
    %338 = arith.addf %336, %337 : vector<8x128xf32>
    %339 = vector.extract_strided_slice %338 {offsets = [0, 0], sizes = [8, 64], strides = [1, 1]} : vector<8x128xf32> to vector<8x64xf32>
    %340 = arith.negf %339 : vector<8x64xf32>
    %341 = math.exp %340 : vector<8x64xf32>
    %cst_103 = arith.constant 1.000000e+00 : f32
    %342 = vector.broadcast %cst_103 : f32 to vector<8x64xf32>
    %343 = arith.addf %342, %341 : vector<8x64xf32>
    %344 = arith.divf %342, %343 : vector<8x64xf32>
    %345 = vector.extract_strided_slice %344 {offsets = [0, 0], sizes = [8, 32], strides = [1, 1]} : vector<8x64xf32> to vector<8x32xf32>
    %346 = vector.extract_strided_slice %344 {offsets = [0, 32], sizes = [8, 32], strides = [1, 1]} : vector<8x64xf32> to vector<8x32xf32>
    %347 = vector.extract_strided_slice %338 {offsets = [0, 64], sizes = [8, 32], strides = [1, 1]} : vector<8x128xf32> to vector<8x32xf32>
    %348 = vector.extract_strided_slice %338 {offsets = [0, 96], sizes = [8, 32], strides = [1, 1]} : vector<8x128xf32> to vector<8x32xf32>
    %349 = arith.mulf %345, %348 : vector<8x32xf32>
    %350 = arith.addf %347, %349 : vector<8x32xf32>
    %351 = math.tanh %350 : vector<8x32xf32>
    %352 = arith.subf %331, %351 : vector<8x32xf32>
    %353 = arith.mulf %346, %352 : vector<8x32xf32>
    %354 = arith.addf %351, %353 : vector<8x32xf32>
    %cst_104 = arith.constant dense<0.000000e+00> : vector<8x8xf32>
    %355 = tpu.matmul %354, %5, %cst_104 {dimension_numbers = #tpu.dot_dimension_numbers<[1], [0], [0], [1], [0, 0, 1, 1], [], []>} : vector<8x32xf32>, vector<32x8xf32>, vector<8x8xf32> -> vector<8x8xf32>
    %356 = vector.broadcast %6 : vector<1x8xf32> to vector<8x8xf32>
    %357 = arith.addf %355, %356 : vector<8x8xf32>
    %358 = arith.index_cast %c9_i32 : i32 to index
    %c0_105 = arith.constant 0 : index
    %c0_106 = arith.constant 0 : index
    %359 = vector.load %arg9[%358, %c0_105, %c0_106] : memref<12x8x8xf32, #tpu.memory_space<vmem>>, vector<1x8x8xf32>
    %360 = vector.shape_cast %359 : vector<1x8x8xf32> to vector<8x8xf32>
    %361 = vector.shape_cast %357 : vector<8x8xf32> to vector<1x8x8xf32>
    tpu.vector_store %arg9[%358, %c0_105, %c0_106], %361 {strides = array<i32>} : memref<12x8x8xf32, #tpu.memory_space<vmem>>, vector<1x8x8xf32>,
    %362 = arith.index_cast %c9_i32 : i32 to index
    %c0_107 = arith.constant 0 : index
    %c0_108 = arith.constant 0 : index
    %363 = vector.load %arg4[%362, %c0_107, %c0_108] : memref<12x8x32xf32, #tpu.memory_space<vmem>>, vector<1x8x32xf32>
    %364 = vector.shape_cast %363 : vector<1x8x32xf32> to vector<8x32xf32>
    %cst_109 = arith.constant 5.000000e-02 : f32
    %365 = vector.broadcast %cst_109 : f32 to vector<8x32xf32>
    %366 = arith.mulf %365, %364 : vector<8x32xf32>
    %367 = arith.addf %354, %366 : vector<8x32xf32>
    %c10_i32 = arith.constant 10 : i32
    %368 = arith.index_cast %c10_i32 : i32 to index
    %c0_110 = arith.constant 0 : index
    %c0_111 = arith.constant 0 : index
    %369 = vector.load %arg2[%368, %c0_110, %c0_111] : memref<12x8x16xf32, #tpu.memory_space<vmem>>, vector<1x8x16xf32>
    %370 = vector.shape_cast %369 : vector<1x8x16xf32> to vector<8x16xf32>
    %371 = tpu.concatenate %370, %367 in 1 : vector<8x16xf32>, vector<8x32xf32> -> vector<8x48xf32>
    %cst_112 = arith.constant dense<0.000000e+00> : vector<8x128xf32>
    %372 = tpu.matmul %371, %3, %cst_112 {dimension_numbers = #tpu.dot_dimension_numbers<[1], [0], [0], [1], [0, 0, 1, 1], [], []>} : vector<8x48xf32>, vector<48x128xf32>, vector<8x128xf32> -> vector<8x128xf32>
    %373 = vector.broadcast %4 : vector<1x128xf32> to vector<8x128xf32>
    %374 = arith.addf %372, %373 : vector<8x128xf32>
    %375 = vector.extract_strided_slice %374 {offsets = [0, 0], sizes = [8, 64], strides = [1, 1]} : vector<8x128xf32> to vector<8x64xf32>
    %376 = arith.negf %375 : vector<8x64xf32>
    %377 = math.exp %376 : vector<8x64xf32>
    %cst_113 = arith.constant 1.000000e+00 : f32
    %378 = vector.broadcast %cst_113 : f32 to vector<8x64xf32>
    %379 = arith.addf %378, %377 : vector<8x64xf32>
    %380 = arith.divf %378, %379 : vector<8x64xf32>
    %381 = vector.extract_strided_slice %380 {offsets = [0, 0], sizes = [8, 32], strides = [1, 1]} : vector<8x64xf32> to vector<8x32xf32>
    %382 = vector.extract_strided_slice %380 {offsets = [0, 32], sizes = [8, 32], strides = [1, 1]} : vector<8x64xf32> to vector<8x32xf32>
    %383 = vector.extract_strided_slice %374 {offsets = [0, 64], sizes = [8, 32], strides = [1, 1]} : vector<8x128xf32> to vector<8x32xf32>
    %384 = vector.extract_strided_slice %374 {offsets = [0, 96], sizes = [8, 32], strides = [1, 1]} : vector<8x128xf32> to vector<8x32xf32>
    %385 = arith.mulf %381, %384 : vector<8x32xf32>
    %386 = arith.addf %383, %385 : vector<8x32xf32>
    %387 = math.tanh %386 : vector<8x32xf32>
    %388 = arith.subf %367, %387 : vector<8x32xf32>
    %389 = arith.mulf %382, %388 : vector<8x32xf32>
    %390 = arith.addf %387, %389 : vector<8x32xf32>
    %cst_114 = arith.constant dense<0.000000e+00> : vector<8x8xf32>
    %391 = tpu.matmul %390, %5, %cst_114 {dimension_numbers = #tpu.dot_dimension_numbers<[1], [0], [0], [1], [0, 0, 1, 1], [], []>} : vector<8x32xf32>, vector<32x8xf32>, vector<8x8xf32> -> vector<8x8xf32>
    %392 = vector.broadcast %6 : vector<1x8xf32> to vector<8x8xf32>
    %393 = arith.addf %391, %392 : vector<8x8xf32>
    %394 = arith.index_cast %c10_i32 : i32 to index
    %c0_115 = arith.constant 0 : index
    %c0_116 = arith.constant 0 : index
    %395 = vector.load %arg9[%394, %c0_115, %c0_116] : memref<12x8x8xf32, #tpu.memory_space<vmem>>, vector<1x8x8xf32>
    %396 = vector.shape_cast %395 : vector<1x8x8xf32> to vector<8x8xf32>
    %397 = vector.shape_cast %393 : vector<8x8xf32> to vector<1x8x8xf32>
    tpu.vector_store %arg9[%394, %c0_115, %c0_116], %397 {strides = array<i32>} : memref<12x8x8xf32, #tpu.memory_space<vmem>>, vector<1x8x8xf32>,
    %398 = arith.index_cast %c10_i32 : i32 to index
    %c0_117 = arith.constant 0 : index
    %c0_118 = arith.constant 0 : index
    %399 = vector.load %arg4[%398, %c0_117, %c0_118] : memref<12x8x32xf32, #tpu.memory_space<vmem>>, vector<1x8x32xf32>
    %400 = vector.shape_cast %399 : vector<1x8x32xf32> to vector<8x32xf32>
    %cst_119 = arith.constant 5.000000e-02 : f32
    %401 = vector.broadcast %cst_119 : f32 to vector<8x32xf32>
    %402 = arith.mulf %401, %400 : vector<8x32xf32>
    %403 = arith.addf %390, %402 : vector<8x32xf32>
    %c11_i32 = arith.constant 11 : i32
    %404 = arith.index_cast %c11_i32 : i32 to index
    %c0_120 = arith.constant 0 : index
    %c0_121 = arith.constant 0 : index
    %405 = vector.load %arg2[%404, %c0_120, %c0_121] : memref<12x8x16xf32, #tpu.memory_space<vmem>>, vector<1x8x16xf32>
    %406 = vector.shape_cast %405 : vector<1x8x16xf32> to vector<8x16xf32>
    %407 = tpu.concatenate %406, %403 in 1 : vector<8x16xf32>, vector<8x32xf32> -> vector<8x48xf32>
    %cst_122 = arith.constant dense<0.000000e+00> : vector<8x128xf32>
    %408 = tpu.matmul %407, %3, %cst_122 {dimension_numbers = #tpu.dot_dimension_numbers<[1], [0], [0], [1], [0, 0, 1, 1], [], []>} : vector<8x48xf32>, vector<48x128xf32>, vector<8x128xf32> -> vector<8x128xf32>
    %409 = vector.broadcast %4 : vector<1x128xf32> to vector<8x128xf32>
    %410 = arith.addf %408, %409 : vector<8x128xf32>
    %411 = vector.extract_strided_slice %410 {offsets = [0, 0], sizes = [8, 64], strides = [1, 1]} : vector<8x128xf32> to vector<8x64xf32>
    %412 = arith.negf %411 : vector<8x64xf32>
    %413 = math.exp %412 : vector<8x64xf32>
    %cst_123 = arith.constant 1.000000e+00 : f32
    %414 = vector.broadcast %cst_123 : f32 to vector<8x64xf32>
    %415 = arith.addf %414, %413 : vector<8x64xf32>
    %416 = arith.divf %414, %415 : vector<8x64xf32>
    %417 = vector.extract_strided_slice %416 {offsets = [0, 0], sizes = [8, 32], strides = [1, 1]} : vector<8x64xf32> to vector<8x32xf32>
    %418 = vector.extract_strided_slice %416 {offsets = [0, 32], sizes = [8, 32], strides = [1, 1]} : vector<8x64xf32> to vector<8x32xf32>
    %419 = vector.extract_strided_slice %410 {offsets = [0, 64], sizes = [8, 32], strides = [1, 1]} : vector<8x128xf32> to vector<8x32xf32>
    %420 = vector.extract_strided_slice %410 {offsets = [0, 96], sizes = [8, 32], strides = [1, 1]} : vector<8x128xf32> to vector<8x32xf32>
    %421 = arith.mulf %417, %420 : vector<8x32xf32>
    %422 = arith.addf %419, %421 : vector<8x32xf32>
    %423 = math.tanh %422 : vector<8x32xf32>
    %424 = arith.subf %403, %423 : vector<8x32xf32>
    %425 = arith.mulf %418, %424 : vector<8x32xf32>
    %426 = arith.addf %423, %425 : vector<8x32xf32>
    %cst_124 = arith.constant dense<0.000000e+00> : vector<8x8xf32>
    %427 = tpu.matmul %426, %5, %cst_124 {dimension_numbers = #tpu.dot_dimension_numbers<[1], [0], [0], [1], [0, 0, 1, 1], [], []>} : vector<8x32xf32>, vector<32x8xf32>, vector<8x8xf32> -> vector<8x8xf32>
    %428 = vector.broadcast %6 : vector<1x8xf32> to vector<8x8xf32>
    %429 = arith.addf %427, %428 : vector<8x8xf32>
    %430 = arith.index_cast %c11_i32 : i32 to index
    %c0_125 = arith.constant 0 : index
    %c0_126 = arith.constant 0 : index
    %431 = vector.load %arg9[%430, %c0_125, %c0_126] : memref<12x8x8xf32, #tpu.memory_space<vmem>>, vector<1x8x8xf32>
    %432 = vector.shape_cast %431 : vector<1x8x8xf32> to vector<8x8xf32>
    %433 = vector.shape_cast %429 : vector<8x8xf32> to vector<1x8x8xf32>
    tpu.vector_store %arg9[%430, %c0_125, %c0_126], %433 {strides = array<i32>} : memref<12x8x8xf32, #tpu.memory_space<vmem>>, vector<1x8x8xf32>,
    %434 = arith.index_cast %c11_i32 : i32 to index
    %c0_127 = arith.constant 0 : index
    %c0_128 = arith.constant 0 : index
    %435 = vector.load %arg4[%434, %c0_127, %c0_128] : memref<12x8x32xf32, #tpu.memory_space<vmem>>, vector<1x8x32xf32>
    %436 = vector.shape_cast %435 : vector<1x8x32xf32> to vector<8x32xf32>
    %cst_129 = arith.constant 5.000000e-02 : f32
    %437 = vector.broadcast %cst_129 : f32 to vector<8x32xf32>
    %438 = arith.mulf %437, %436 : vector<8x32xf32>
    %439 = arith.addf %426, %438 : vector<8x32xf32>
    %c12_i32 = arith.constant 12 : i32
    %c0_130 = arith.constant 0 : index
    %c0_131 = arith.constant 0 : index
    %440 = vector.load %arg10[%c0_130, %c0_131] : memref<8x32xf32, #tpu.memory_space<vmem>>, vector<8x32xf32>
    tpu.vector_store %arg10[%c0_130, %c0_131], %439 {strides = array<i32>} : memref<8x32xf32, #tpu.memory_space<vmem>>, vector<8x32xf32>,
    return
  }
  func.func @transform_0(%arg0: i32, %arg1: i32) -> (i32, i32, i32) {
    %c0_i32 = arith.constant 0 : i32
    %c0_i32_0 = arith.constant 0 : i32
    return %arg1, %arg0, %c0_i32 : i32, i32, i32
  }
  func.func @transform_1(%arg0: i32, %arg1: i32) -> (i32, i32) {
    %c0_i32 = arith.constant 0 : i32
    %c0_i32_0 = arith.constant 0 : i32
    return %arg0, %c0_i32 : i32, i32
  }
  func.func @transform_2(%arg0: i32, %arg1: i32) -> (i32, i32, i32) {
    %c0_i32 = arith.constant 0 : i32
    %c0_i32_0 = arith.constant 0 : i32
    return %arg1, %arg0, %c0_i32 : i32, i32, i32
  }
  func.func @transform_3(%arg0: i32, %arg1: i32) -> (i32, i32) {
    %c0_i32 = arith.constant 0 : i32
    %c0_i32_0 = arith.constant 0 : i32
    %c0_i32_1 = arith.constant 0 : i32
    return %c0_i32, %c0_i32_0 : i32, i32
  }
  func.func @transform_4(%arg0: i32, %arg1: i32) -> (i32, i32) {
    %c0_i32 = arith.constant 0 : i32
    %c0_i32_0 = arith.constant 0 : i32
    %c0_i32_1 = arith.constant 0 : i32
    return %c0_i32, %c0_i32_0 : i32, i32
  }
  func.func @transform_5(%arg0: i32, %arg1: i32) -> (i32, i32) {
    %c0_i32 = arith.constant 0 : i32
    %c0_i32_0 = arith.constant 0 : i32
    %c0_i32_1 = arith.constant 0 : i32
    return %c0_i32, %c0_i32_0 : i32, i32
  }
  func.func @transform_6(%arg0: i32, %arg1: i32) -> (i32, i32) {
    %c0_i32 = arith.constant 0 : i32
    %c0_i32_0 = arith.constant 0 : i32
    %c0_i32_1 = arith.constant 0 : i32
    return %c0_i32, %c0_i32_0 : i32, i32
  }
  func.func @transform_7(%arg0: i32, %arg1: i32) -> (i32, i32, i32) {
    %c0_i32 = arith.constant 0 : i32
    %c0_i32_0 = arith.constant 0 : i32
    return %arg1, %arg0, %c0_i32 : i32, i32, i32
  }
  func.func @transform_8(%arg0: i32, %arg1: i32) -> (i32, i32) {
    %c0_i32 = arith.constant 0 : i32
    %c0_i32_0 = arith.constant 0 : i32
    return %arg0, %c0_i32 : i32, i32
  }
}

</mosaic_0001>

<bundles_post_ra>
// kernel: tpu_custom_call.1
= control target key start
LH: loop header
LB: loop body
LE: loop exit
PB: predicated region body
PF: predicated region fallthrough
CT: control target
= control target key end

     0   :  { %14 = vsyncpa [#allocation3], 0  ;;  %s3776_s0 = inlined_call_operand.hbm [shape: f32[12,8,16], index: 0, kind: input, shape index: {}]   ;;  %s3777_s1 = inlined_call_operand.vmem [shape: f32[8,32], index: 1, kind: input, shape index: {}]   ;;  %s3778_s2 = inlined_call_operand.hbm [shape: f32[12,8,32], index: 2, kind: input, shape index: {}]   ;;  %s3779_s3 = inlined_call_operand.hbm [shape: f32[48,128], index: 3, kind: input, shape index: {}]   ;;  %s3780_s4 = inlined_call_operand.vmem [shape: f32[1,128], index: 4, kind: input, shape index: {}]   ;;  %s3781_s5 = inlined_call_operand.vmem [shape: f32[32,8], index: 5, kind: input, shape index: {}]   ;;  %s3782_s6 = inlined_call_operand.vmem [shape: f32[1,8], index: 6, kind: input, shape index: {}]   ;;  %s3783_s7 = inlined_call_operand.vmem [shape: f32[12,8,8], index: 7, kind: output, shape index: {0}]   ;;  %s3784_s8 = inlined_call_operand.hbm [shape: f32[8,32], index: 8, kind: output, shape index: {1}]  }
   0x1   :  { %15 = vsyncpa [#allocation6], 0 }
   0x2   :  { %16 = vsyncpa [#allocation4], 0  ;;  %s3136_s27 = smov [#allocation5]   ;;  %s3137_s29 = smov [#allocation2]  }
   0x3   :  { %s36_s28 = sshll.u32 %s3136_s27, 4  ;;  %s22_s30 = sshll.u32 %s3137_s29, 4  ;;  %s37_s28 = int_to_ptr.vmem [resolvable:$true] %s36_s28  ;;  %s23_s30 = int_to_ptr.vmem [resolvable:$true] %s22_s30 }
   0x4   :  { %s3058_s9 = scalar_lea.vmem %s37_s28, 1536  ;;  %p3063_p1 = scmp.lt.s32.totalorder %s37_s28, %s37_s28 }
   0x5   :  { %p3059_p0 = scmp.ne.s32.totalorder %s37_s28, %s3058_s9  ;;  %p3064_p2 = scmp.lt.s32.totalorder %s3058_s9, %s3058_s9 }
   0x7   :  { %p3065_p3 = por %p3064_p2, %p3063_p1 }
   0x9   :  { %p3066_p4 = pnand %p3065_p3, %p3059_p0 }
   0xb   :  { %3069 = shalt.err (!%p3066_p4)
}
   0xc   :  { %s3138_s10 = smov 128   ;;  %s3139_s11 = smov 8  }
   0xd   :  { %42 = dma.hbm_to_vmem [thread:$0]  %s3778_s2, 1536, %s37_s28, [#allocation6], %s3138_s10, %s3138_s10, %s3139_s11  }
   0xe   :  { %s3078_s14 = scalar_lea.vmem %s23_s30, 1536  ;;  %p3083_p6 = scmp.lt.s32.totalorder %s23_s30, %s23_s30 }
   0xf   :  { %p3079_p5 = scmp.ne.s32.totalorder %s23_s30, %s3078_s14  ;;  %p3084_p7 = scmp.lt.s32.totalorder %s3078_s14, %s3078_s14 }
  0x11   :  { %p3085_p8 = por %p3084_p7, %p3083_p6 }
  0x13   :  { %p3086_p9 = pnand %p3085_p8, %p3079_p5 }
  0x15   :  { %3089 = shalt.err (!%p3086_p9)
}
  0x16   :  { %28 = dma.hbm_to_vmem [thread:$0]  %s3776_s0, 1536, %s23_s30, [#allocation3], %s3138_s10, %s3138_s10, %s3139_s11  }
  0x17   :  { %s3140_s17 = smov [#allocation7]  }
  0x18   :  { %s48_s18 = sshll.u32 %s3140_s17, 4  ;;  %s49_s18 = int_to_ptr.vmem [resolvable:$true] %s48_s18 }
  0x19   :  { %s3098_s19 = scalar_lea.vmem %s49_s18, 768  ;;  %p3103_p11 = scmp.lt.s32.totalorder %s49_s18, %s49_s18 }
  0x1a   :  { %p3099_p10 = scmp.ne.s32.totalorder %s49_s18, %s3098_s19  ;;  %p3104_p12 = scmp.lt.s32.totalorder %s3098_s19, %s3098_s19 }
  0x1c   :  { %p3105_p13 = por %p3104_p12, %p3103_p11 }
  0x1e   :  { %p3106_p0 = pnand %p3105_p13, %p3099_p10 }
  0x20   :  { %3109 = shalt.err (!%p3106_p0)
}
  0x21   :  { %54 = dma.hbm_to_vmem [thread:$0]  %s3779_s3, 768, %s49_s18, [#allocation6], %s3138_s10, %s3138_s10, %s3139_s11  }
  0x22   :  { %3130 = dma.done.wait [#allocation3], 1536  }
  0x23   :  { %3131 = vsyncadd [#allocation3], 4294965760 }
  0x24   :  { %3132 = dma.done.wait [#allocation6], 2304  }
  0x25   :  { %3133 = vsyncadd [#allocation6], 4294964992  ;;  %v3141_v0 = vmov 0.0   ;;  %vm3142_vm0 = vmmov 0   ;;  %vm75_vm1 = vcmask 261120   ;;  %v74_v1 = vld [vmem:[%s3777_s1] sm:$0xff] }
  0x26   :  { %2641 = vmatprep.subr.mxu0 %v3141_v0  ;;  %2656 = vmatprep.subr.mxu1 %v3141_v0  ;;  %v3212_v2 = vld [vmem:[#allocation7 + $0x28] sm:$0xff]  ;;  %v3214_v3 = vld [vmem:[#allocation7 + $0x20] sm:$0xff]  ;;  %76 = vst.msk [vmem:[#allocation8] sm:$0xff] %vm75_vm1, %v74_v1  ;;  %v3219_v4 = vld [vmem:[#allocation7 + $0x18] sm:$0xff]  ;;  %s3143_s1 = smov 16   ;;  %vm95_vm2 = vcmask 130048  }
  0x27   :  { %2653 = vmatprep.mubr.msk.f32.mxu0 %vm3142_vm0, %v3141_v0  ;;  %2664 = vmatprep.mubr.msk.f32.mxu1 %vm3142_vm0, %v3141_v0  ;;  %v3223_v5 = vld [vmem:[#allocation7 + $0x10] sm:$0xff]  ;;  %v3227_v6 = vld [vmem:[#allocation7 + $0x8] sm:$0xff]  ;;  %v3231_v8 = vld [vmem:[#allocation7] sm:$0xff]  ;;  %vm103_vm3 = vcmask 392192   ;;  %s3144_s23 = smov 32   ;;  %s3145_s24 = smov 64  }
  0x28   :  { %2642 = vmatpush3.msra.mxu0 %v3212_v2  ;;  %v90_v9 = vld [vmem:[#allocation2] sm:$0xff]  ;;  %v3255_v29 = vld [vmem:[%s3781_s5 + $0x18] sm:$0xff]  ;;  %v3260_v30 = vld [vmem:[%s3781_s5 + $0x10] sm:$0xff]  ;;  %s3146_s11 = smov 80   ;;  %vm291_vm4 = vcmask 64512   ;;  %s3147_s16 = smov 96  }
  0x29   :  { %2643 = vmatprep.subr.mxu0 %v3141_v0  ;;  %v3244_v12 = vld [vmem:[%s3780_s4] ss:$0 sm:$0xff]  ;;  %2657 = vmatpush3.msra.mxu1 %v3255_v29  ;;  %v3268_v31 = vld [vmem:[%s3781_s5 + $0x8] sm:$0xff] }
  0x2a   :  { %2644 = vmatpush3.msra.mxu0 %v3214_v3  ;;  %v293_v26 = vld [vmem:[#allocation5] sm:$0xff]  ;;  %2658 = vmatprep.subr.mxu1 %v3141_v0  ;;  %v301_v40 = vld [vmem:[#allocation2 + $0x8] sm:$0xff] }
  0x2b   :  { %2645 = vmatprep.subr.mxu0 %v3141_v0  ;;  %v294_v28 = vmul.f32 0.05, %v293_v26  ;;  %2659 = vmatpush3.msra.mxu1 %v3260_v30  ;;  %v3277_v32 = vld [vmem:[%s3781_s5] sm:$0xff]  ;;  %v486_v59 = vld [vmem:[#allocation5 + $0x8] sm:$0xff] }
  0x2c   :  { %2646 = vmatpush3.msra.mxu0 %v3219_v4  ;;  %2660 = vmatprep.subr.mxu1 %v3141_v0  ;;  %v3321_v43 = vld [vmem:[%s3782_s6] ss:$0 sm:$0xff]  ;;  %v487_v61 = vmul.f32 0.05, %v486_v59 }
  0x2d   :  { %2647 = vmatprep.subr.mxu0 %v3141_v0  ;;  %v89_v7 = vld [vmem:[#allocation8] sm:$0xff]  ;;  %2661 = vmatpush3.msra.mxu1 %v3268_v31 }
  0x2e   :  { %2648 = vmatpush3.msra.mxu0 %v3223_v5  ;;  %92 = vrot.lane.b32.xlu0 %v89_v7, %s3143_s1 }
  0x2f   :  { %2649 = vmatprep.subr.mxu0 %v3141_v0  ;;  %2662 = vmatprep.subr.mxu1 %v3141_v0 }
  0x30   :  { %2650 = vmatpush3.msra.mxu0 %v3227_v6  ;;  %2663 = vmatpush3.msra.mxu1 %v3277_v32 }
  0x31   :  { %2651 = vmatprep.subr.mxu0 %v3141_v0  ;;  %2667 = vmatprep.subr.mxu1 %v3141_v0 }
  0x32   :  { %2652 = vmatpush3.msra.mxu0 %v3231_v8 }
  0x33   :  { %2682 = vmatprep.subr.mxu0 %v3141_v0 }
  0xa0   :  { %v93_v10 = vpop.permute.xlu0 %92 }
  0xa1   :  { %v96_v11 = vsel %vm95_vm2, %v90_v9, %v93_v10 }
  0xa2   :  { %2654 = vmatmul.mubr.msk.f32.vlgmr.msra.gmra.mxu0 %vm103_vm3, %v96_v11 }
  0xa3   :  { %2690 = vmatprep.mubr.msk.f32.mxu0 %vm3142_vm0, %v3141_v0  ;;  %2683 = vmatpush3.msra.mxu0 %v3255_v29 }
  0xa4   :  { %2684 = vmatprep.subr.mxu0 %v3141_v0 }
  0xa5   :  { %2685 = vmatpush3.msra.mxu0 %v3260_v30 }
  0xa6   :  { %2686 = vmatprep.subr.mxu0 %v3141_v0 }
  0xa7   :  { %2687 = vmatpush3.msra.mxu0 %v3268_v31 }
  0xa8   :  { %2688 = vmatprep.subr.mxu0 %v3141_v0 }
  0xa9   :  { %2689 = vmatpush3.msra.mxu0 %v3277_v32 }
  0xaa   :  { %2693 = vmatprep.subr.mxu0 %v3141_v0 }
 0x162   :  { %v173_v13 = vpop.f32.mrf.mxu0 }
 0x163   :  { %v174_v14 = vadd.f32 %v3244_v12, %v173_v13  ;;  %v494_v13 = vld [vmem:[#allocation2 + $0x10] sm:$0xff] }
 0x164   :  { %v2655_v15 = vpop.f32.mrf.mxu0 }
 0x165   :  { %184 = vrot.lane.b32.xlu0 %v174_v14, %s3144_s23  ;;  %v2450_v16 = vmul.f32 -1.442695, %v174_v14 }
 0x167   :  { %2966 = vpow2.f32 %v2450_v16 }
 0x174   :  { %v2967_v17 = vpop.eup %2966 }
 0x175   :  { %v180_v18 = vadd.f32 1.0, %v2967_v17 }
 0x177   :  { %2968 = vrcp.f32 %v180_v18 }
 0x184   :  { %v2969_v19 = vpop.eup %2968 }
 0x1d7   :  { %v185_v20 = vpop.permute.xlu0 %184 }
 0x1d8   :  { %v187_v21 = vmul.f32 %v2969_v19, %v185_v20 }
 0x1da   :  { %189 = vrot.lane.b32.xlu1 %v187_v21, %s3145_s24 }
 0x24c   :  { %v190_v22 = vpop.permute.xlu1 %189 }
 0x24d   :  { %v192_v23 = vadd.f32 %v190_v22, %v174_v14 }
 0x24f   :  { %2970 = vtanh.f32 %v192_v23 }
 0x25c   :  { %v2971_v24 = vpop.eup %2970 }
 0x25d   :  { %195 = vrot.lane.b32.xlu1 %v2971_v24, %s3145_s24 }
 0x2cf   :  { %v196_v25 = vpop.permute.xlu1 %195 }
 0x2d0   :  { %v198_v27 = vsub.f32 %v89_v7, %v196_v25 }
 0x2d2   :  { %200 = vrot.lane.b32.xlu0 %v198_v27, %s3144_s23 }
 0x2d6   :  { %296 = vrot.lane.b32.xlu0 %v294_v28, %s3145_s24 }
 0x344   :  { %v201_v33 = vpop.permute.xlu0 %200 }
 0x345   :  { %v203_v34 = vmul.f32 %v2969_v19, %v201_v33 }
 0x347   :  { %205 = vrot.lane.b32.xlu1 %v203_v34, %s3144_s23 }
 0x348   :  { %v297_v36 = vpop.permute.xlu0 %296 }
 0x3b9   :  { %v206_v35 = vpop.permute.xlu1 %205 }
 0x3ba   :  { %v208_v37 = vadd.f32 %v2971_v24, %v206_v35  ;;  %v679_v35 = vld [vmem:[#allocation5 + $0x10] sm:$0xff] }
 0x3bc   :  { %v299_v38 = vadd.f32 %v297_v36, %v208_v37  ;;  %216 = vrot.lane.b32.xlu1 %v208_v37, %s3145_s24  ;;  %v680_v37 = vmul.f32 0.05, %v679_v35 }
 0x3be   :  { %303 = vrot.lane.b32.xlu0 %v299_v38, %s3146_s11 }
 0x42e   :  { %v217_v39 = vpop.permute.xlu1 %216 }
 0x42f   :  { %2665 = vmatmul.mubr.msk.f32.vlgmr.msra.gmra.mxu1 %vm75_vm1, %v217_v39 }
 0x430   :  { %2668 = vmatpush3.msra.mxu1 %v3212_v2  ;;  %2679 = vmatprep.mubr.msk.f32.mxu1 %vm3142_vm0, %v3141_v0  ;;  %v304_v41 = vpop.permute.xlu0 %303 }
 0x431   :  { %2669 = vmatprep.subr.mxu1 %v3141_v0  ;;  %v306_v42 = vsel %vm95_vm2, %v301_v40, %v304_v41 }
 0x432   :  { %2670 = vmatpush3.msra.mxu1 %v3214_v3 }
 0x433   :  { %2671 = vmatprep.subr.mxu1 %v3141_v0 }
 0x434   :  { %2672 = vmatpush3.msra.mxu1 %v3219_v4 }
 0x435   :  { %2673 = vmatprep.subr.mxu1 %v3141_v0 }
 0x436   :  { %2674 = vmatpush3.msra.mxu1 %v3223_v5 }
 0x437   :  { %2675 = vmatprep.subr.mxu1 %v3141_v0 }
 0x438   :  { %2676 = vmatpush3.msra.mxu1 %v3227_v6 }
 0x439   :  { %2677 = vmatprep.subr.mxu1 %v3141_v0 }
 0x43a   :  { %2678 = vmatpush3.msra.mxu1 %v3231_v8 }
 0x43b   :  { %2680 = vmatmul.mubr.msk.f32.vlgmr.msra.gmra.mxu1 %vm103_vm3, %v306_v42  ;;  %2708 = vmatprep.subr.mxu1 %v3141_v0 }
 0x43c   :  { %2709 = vmatpush3.msra.mxu1 %v3255_v29  ;;  %2716 = vmatprep.mubr.msk.f32.mxu1 %vm3142_vm0, %v3141_v0 }
 0x43d   :  { %2710 = vmatprep.subr.mxu1 %v3141_v0 }
 0x43e   :  { %2711 = vmatpush3.msra.mxu1 %v3260_v30 }
 0x43f   :  { %2712 = vmatprep.subr.mxu1 %v3141_v0 }
 0x440   :  { %2713 = vmatpush3.msra.mxu1 %v3268_v31 }
 0x441   :  { %2714 = vmatprep.subr.mxu1 %v3141_v0 }
 0x442   :  { %2715 = vmatpush3.msra.mxu1 %v3277_v32 }
 0x443   :  { %2719 = vmatprep.subr.mxu1 %v3141_v0 }
 0x4ef   :  { %v287_v44 = vpop.f32.mrf.mxu1 }
 0x4f0   :  { %v288_v45 = vadd.f32 %v3321_v43, %v287_v44 }
 0x4f1   :  { %v2666_v46 = vpop.f32.mrf.mxu1 }
 0x4f2   :  { %292 = vst.msk [vmem:[%s3783_s7] sm:$0xff] %vm291_vm4, %v288_v45  ;;  %v687_v46 = vld [vmem:[#allocation2 + $0x18] sm:$0xff] }
 0x4fb   :  { %v376_v47 = vpop.f32.mrf.mxu1 }
 0x4fc   :  { %v377_v48 = vadd.f32 %v3244_v12, %v376_v47 }
 0x4fd   :  { %v2681_v49 = vpop.f32.mrf.mxu1 }
 0x4fe   :  { %387 = vrot.lane.b32.xlu1 %v377_v48, %s3144_s23  ;;  %v2454_v50 = vmul.f32 -1.442695, %v377_v48 }
 0x500   :  { %2972 = vpow2.f32 %v2454_v50 }
 0x50d   :  { %v2973_v51 = vpop.eup %2972 }
 0x50e   :  { %v383_v52 = vadd.f32 1.0, %v2973_v51 }
 0x510   :  { %2974 = vrcp.f32 %v383_v52 }
 0x51d   :  { %v2975_v53 = vpop.eup %2974 }
 0x570   :  { %v388_v54 = vpop.permute.xlu1 %387 }
 0x571   :  { %v390_v55 = vmul.f32 %v2975_v53, %v388_v54 }
 0x573   :  { %392 = vrot.lane.b32.xlu0 %v390_v55, %s3145_s24 }
 0x5e5   :  { %v393_v56 = vpop.permute.xlu0 %392 }
 0x5e6   :  { %v395_v57 = vadd.f32 %v393_v56, %v377_v48 }
 0x5e8   :  { %2976 = vtanh.f32 %v395_v57 }
 0x5f5   :  { %v2977_v58 = vpop.eup %2976 }
 0x5f6   :  { %v397_v60 = vsub.f32 %v299_v38, %v2977_v58 }
 0x5f8   :  { %399 = vrot.lane.b32.xlu1 %v397_v60, %s3147_s16 }
 0x5fc   :  { %489 = vrot.lane.b32.xlu1 %v487_v61, %s3145_s24 }
 0x66a   :  { %v400_v62 = vpop.permute.xlu1 %399 }
 0x66b   :  { %v402_v63 = vmul.f32 %v2975_v53, %v400_v62 }
 0x66d   :  { %404 = vrot.lane.b32.xlu0 %v402_v63, %s3144_s23 }
 0x66e   :  { %v490_v7 = vpop.permute.xlu1 %489 }
 0x6df   :  { %v405_v1 = vpop.permute.xlu0 %404 }
 0x6e0   :  { %v407_v9 = vadd.f32 %v2977_v58, %v405_v1  ;;  %v872_v1 = vld [vmem:[#allocation5 + $0x18] sm:$0xff] }
 0x6e2   :  { %v492_v10 = vadd.f32 %v490_v7, %v407_v9  ;;  %409 = vrot.lane.b32.xlu0 %v407_v9, %s3145_s24  ;;  %v873_v9 = vmul.f32 0.05, %v872_v1 }
 0x6e4   :  { %496 = vrot.lane.b32.xlu1 %v492_v10, %s3146_s11 }
 0x754   :  { %v410_v11 = vpop.permute.xlu0 %409 }
 0x755   :  { %2691 = vmatmul.mubr.msk.f32.vlgmr.msra.gmra.mxu0 %vm75_vm1, %v410_v11 }
 0x756   :  { %2694 = vmatpush3.msra.mxu0 %v3212_v2  ;;  %2705 = vmatprep.mubr.msk.f32.mxu0 %vm3142_vm0, %v3141_v0  ;;  %v497_v14 = vpop.permute.xlu1 %496 }
 0x757   :  { %2695 = vmatprep.subr.mxu0 %v3141_v0  ;;  %v499_v15 = vsel %vm95_vm2, %v494_v13, %v497_v14 }
 0x758   :  { %2696 = vmatpush3.msra.mxu0 %v3214_v3 }
 0x759   :  { %2697 = vmatprep.subr.mxu0 %v3141_v0 }
 0x75a   :  { %2698 = vmatpush3.msra.mxu0 %v3219_v4 }
 0x75b   :  { %2699 = vmatprep.subr.mxu0 %v3141_v0 }
 0x75c   :  { %2700 = vmatpush3.msra.mxu0 %v3223_v5 }
 0x75d   :  { %2701 = vmatprep.subr.mxu0 %v3141_v0 }
 0x75e   :  { %2702 = vmatpush3.msra.mxu0 %v3227_v6 }
 0x75f   :  { %2703 = vmatprep.subr.mxu0 %v3141_v0 }
 0x760   :  { %2704 = vmatpush3.msra.mxu0 %v3231_v8 }
 0x761   :  { %2706 = vmatmul.mubr.msk.f32.vlgmr.msra.gmra.mxu0 %vm103_vm3, %v499_v15  ;;  %2734 = vmatprep.subr.mxu0 %v3141_v0 }
 0x762   :  { %2735 = vmatpush3.msra.mxu0 %v3255_v29  ;;  %2742 = vmatprep.mubr.msk.f32.mxu0 %vm3142_vm0, %v3141_v0 }
 0x763   :  { %2736 = vmatprep.subr.mxu0 %v3141_v0 }
 0x764   :  { %2737 = vmatpush3.msra.mxu0 %v3260_v30 }
 0x765   :  { %2738 = vmatprep.subr.mxu0 %v3141_v0 }
 0x766   :  { %2739 = vmatpush3.msra.mxu0 %v3268_v31 }
 0x767   :  { %2740 = vmatprep.subr.mxu0 %v3141_v0 }
 0x768   :  { %2741 = vmatpush3.msra.mxu0 %v3277_v32 }
 0x769   :  { %2745 = vmatprep.subr.mxu0 %v3141_v0 }
 0x815   :  { %v479_v16 = vpop.f32.mrf.mxu0 }
 0x816   :  { %v480_v17 = vadd.f32 %v3321_v43, %v479_v16 }
 0x817   :  { %v2692_v18 = vpop.f32.mrf.mxu0 }
 0x818   :  { %2456 = vst.msk [vmem:[%s3783_s7 + $0x8] sm:$0xff] %vm291_vm4, %v480_v17  ;;  %v880_v18 = vld [vmem:[#allocation2 + $0x20] sm:$0xff] }
 0x821   :  { %v569_v19 = vpop.f32.mrf.mxu0 }
 0x822   :  { %v570_v20 = vadd.f32 %v3244_v12, %v569_v19 }
 0x823   :  { %v2707_v21 = vpop.f32.mrf.mxu0 }
 0x824   :  { %580 = vrot.lane.b32.xlu0 %v570_v20, %s3144_s23  ;;  %v2458_v22 = vmul.f32 -1.442695, %v570_v20 }
 0x826   :  { %2978 = vpow2.f32 %v2458_v22 }
 0x833   :  { %v2979_v23 = vpop.eup %2978 }
 0x834   :  { %v576_v24 = vadd.f32 1.0, %v2979_v23 }
 0x836   :  { %2980 = vrcp.f32 %v576_v24 }
 0x843   :  { %v2981_v25 = vpop.eup %2980 }
 0x896   :  { %v581_v26 = vpop.permute.xlu0 %580 }
 0x897   :  { %v583_v27 = vmul.f32 %v2981_v25, %v581_v26 }
 0x899   :  { %585 = vrot.lane.b32.xlu1 %v583_v27, %s3145_s24 }
 0x90b   :  { %v586_v28 = vpop.permute.xlu1 %585 }
 0x90c   :  { %v588_v33 = vadd.f32 %v586_v28, %v570_v20 }
 0x90e   :  { %2982 = vtanh.f32 %v588_v33 }
 0x91b   :  { %v2983_v34 = vpop.eup %2982 }
 0x91c   :  { %v590_v36 = vsub.f32 %v492_v10, %v2983_v34 }
 0x91e   :  { %592 = vrot.lane.b32.xlu0 %v590_v36, %s3147_s16 }
 0x922   :  { %682 = vrot.lane.b32.xlu0 %v680_v37, %s3145_s24 }
 0x990   :  { %v593_v38 = vpop.permute.xlu0 %592 }
 0x991   :  { %v595_v39 = vmul.f32 %v2981_v25, %v593_v38 }
 0x993   :  { %597 = vrot.lane.b32.xlu1 %v595_v39, %s3144_s23 }
 0x994   :  { %v683_v41 = vpop.permute.xlu0 %682 }
 0xa05   :  { %v598_v40 = vpop.permute.xlu1 %597 }
 0xa06   :  { %v600_v42 = vadd.f32 %v2983_v34, %v598_v40  ;;  %v1065_v40 = vld [vmem:[#allocation5 + $0x20] sm:$0xff] }
 0xa08   :  { %v685_v44 = vadd.f32 %v683_v41, %v600_v42  ;;  %602 = vrot.lane.b32.xlu1 %v600_v42, %s3145_s24  ;;  %v1066_v42 = vmul.f32 0.05, %v1065_v40 }
 0xa0a   :  { %689 = vrot.lane.b32.xlu0 %v685_v44, %s3146_s11 }
 0xa7a   :  { %v603_v45 = vpop.permute.xlu1 %602 }
 0xa7b   :  { %2717 = vmatmul.mubr.msk.f32.vlgmr.msra.gmra.mxu1 %vm75_vm1, %v603_v45 }
 0xa7c   :  { %2720 = vmatpush3.msra.mxu1 %v3212_v2  ;;  %2731 = vmatprep.mubr.msk.f32.mxu1 %vm3142_vm0, %v3141_v0  ;;  %v690_v47 = vpop.permute.xlu0 %689 }
 0xa7d   :  { %2721 = vmatprep.subr.mxu1 %v3141_v0  ;;  %v692_v48 = vsel %vm95_vm2, %v687_v46, %v690_v47 }
 0xa7e   :  { %2722 = vmatpush3.msra.mxu1 %v3214_v3 }
 0xa7f   :  { %2723 = vmatprep.subr.mxu1 %v3141_v0 }
 0xa80   :  { %2724 = vmatpush3.msra.mxu1 %v3219_v4 }
 0xa81   :  { %2725 = vmatprep.subr.mxu1 %v3141_v0 }
 0xa82   :  { %2726 = vmatpush3.msra.mxu1 %v3223_v5 }
 0xa83   :  { %2727 = vmatprep.subr.mxu1 %v3141_v0 }
 0xa84   :  { %2728 = vmatpush3.msra.mxu1 %v3227_v6 }
 0xa85   :  { %2729 = vmatprep.subr.mxu1 %v3141_v0 }
 0xa86   :  { %2730 = vmatpush3.msra.mxu1 %v3231_v8 }
 0xa87   :  { %2732 = vmatmul.mubr.msk.f32.vlgmr.msra.gmra.mxu1 %vm103_vm3, %v692_v48  ;;  %2760 = vmatprep.subr.mxu1 %v3141_v0 }
 0xa88   :  { %2761 = vmatpush3.msra.mxu1 %v3255_v29  ;;  %2768 = vmatprep.mubr.msk.f32.mxu1 %vm3142_vm0, %v3141_v0 }
 0xa89   :  { %2762 = vmatprep.subr.mxu1 %v3141_v0 }
 0xa8a   :  { %2763 = vmatpush3.msra.mxu1 %v3260_v30 }
 0xa8b   :  { %2764 = vmatprep.subr.mxu1 %v3141_v0 }
 0xa8c   :  { %2765 = vmatpush3.msra.mxu1 %v3268_v31 }
 0xa8d   :  { %2766 = vmatprep.subr.mxu1 %v3141_v0 }
 0xa8e   :  { %2767 = vmatpush3.msra.mxu1 %v3277_v32 }
 0xa8f   :  { %2771 = vmatprep.subr.mxu1 %v3141_v0 }
 0xb3b   :  { %v672_v49 = vpop.f32.mrf.mxu1 }
 0xb3c   :  { %v673_v50 = vadd.f32 %v3321_v43, %v672_v49 }
 0xb3d   :  { %v2718_v51 = vpop.f32.mrf.mxu1 }
 0xb3e   :  { %2460 = vst.msk [vmem:[%s3783_s7 + $0x10] sm:$0xff] %vm291_vm4, %v673_v50  ;;  %v1073_v51 = vld [vmem:[#allocation2 + $0x28] sm:$0xff] }
 0xb47   :  { %v762_v52 = vpop.f32.mrf.mxu1 }
 0xb48   :  { %v763_v53 = vadd.f32 %v3244_v12, %v762_v52 }
 0xb49   :  { %v2733_v54 = vpop.f32.mrf.mxu1 }
 0xb4a   :  { %773 = vrot.lane.b32.xlu1 %v763_v53, %s3144_s23  ;;  %v2462_v55 = vmul.f32 -1.442695, %v763_v53 }
 0xb4c   :  { %2984 = vpow2.f32 %v2462_v55 }
 0xb59   :  { %v2985_v56 = vpop.eup %2984 }
 0xb5a   :  { %v769_v57 = vadd.f32 1.0, %v2985_v56 }
 0xb5c   :  { %2986 = vrcp.f32 %v769_v57 }
 0xb69   :  { %v2987_v58 = vpop.eup %2986 }
 0xbbc   :  { %v774_v59 = vpop.permute.xlu1 %773 }
 0xbbd   :  { %v776_v60 = vmul.f32 %v2987_v58, %v774_v59 }
 0xbbf   :  { %778 = vrot.lane.b32.xlu0 %v776_v60, %s3145_s24 }
 0xc31   :  { %v779_v61 = vpop.permute.xlu0 %778 }
 0xc32   :  { %v781_v62 = vadd.f32 %v779_v61, %v763_v53 }
 0xc34   :  { %2988 = vtanh.f32 %v781_v62 }
 0xc41   :  { %v2989_v63 = vpop.eup %2988 }
 0xc42   :  { %v783_v7 = vsub.f32 %v685_v44, %v2989_v63 }
 0xc44   :  { %785 = vrot.lane.b32.xlu1 %v783_v7, %s3147_s16 }
 0xc48   :  { %875 = vrot.lane.b32.xlu1 %v873_v9, %s3145_s24 }
 0xcb6   :  { %v786_v10 = vpop.permute.xlu1 %785 }
 0xcb7   :  { %v788_v11 = vmul.f32 %v2987_v58, %v786_v10 }
 0xcb9   :  { %790 = vrot.lane.b32.xlu0 %v788_v11, %s3144_s23 }
 0xcba   :  { %v876_v14 = vpop.permute.xlu1 %875 }
 0xd2b   :  { %v791_v13 = vpop.permute.xlu0 %790 }
 0xd2c   :  { %v793_v15 = vadd.f32 %v2989_v63, %v791_v13  ;;  %v1258_v13 = vld [vmem:[#allocation5 + $0x28] sm:$0xff] }
 0xd2e   :  { %v878_v16 = vadd.f32 %v876_v14, %v793_v15  ;;  %795 = vrot.lane.b32.xlu0 %v793_v15, %s3145_s24  ;;  %v1259_v15 = vmul.f32 0.05, %v1258_v13 }
 0xd30   :  { %882 = vrot.lane.b32.xlu1 %v878_v16, %s3146_s11 }
 0xda0   :  { %v796_v17 = vpop.permute.xlu0 %795 }
 0xda1   :  { %2743 = vmatmul.mubr.msk.f32.vlgmr.msra.gmra.mxu0 %vm75_vm1, %v796_v17 }
 0xda2   :  { %2746 = vmatpush3.msra.mxu0 %v3212_v2  ;;  %2757 = vmatprep.mubr.msk.f32.mxu0 %vm3142_vm0, %v3141_v0  ;;  %v883_v19 = vpop.permute.xlu1 %882 }
 0xda3   :  { %2747 = vmatprep.subr.mxu0 %v3141_v0  ;;  %v885_v20 = vsel %vm95_vm2, %v880_v18, %v883_v19 }
 0xda4   :  { %2748 = vmatpush3.msra.mxu0 %v3214_v3 }
 0xda5   :  { %2749 = vmatprep.subr.mxu0 %v3141_v0 }
 0xda6   :  { %2750 = vmatpush3.msra.mxu0 %v3219_v4 }
 0xda7   :  { %2751 = vmatprep.subr.mxu0 %v3141_v0 }
 0xda8   :  { %2752 = vmatpush3.msra.mxu0 %v3223_v5 }
 0xda9   :  { %2753 = vmatprep.subr.mxu0 %v3141_v0 }
 0xdaa   :  { %2754 = vmatpush3.msra.mxu0 %v3227_v6 }
 0xdab   :  { %2755 = vmatprep.subr.mxu0 %v3141_v0 }
 0xdac   :  { %2756 = vmatpush3.msra.mxu0 %v3231_v8 }
 0xdad   :  { %2758 = vmatmul.mubr.msk.f32.vlgmr.msra.gmra.mxu0 %vm103_vm3, %v885_v20  ;;  %2786 = vmatprep.subr.mxu0 %v3141_v0 }
 0xdae   :  { %2787 = vmatpush3.msra.mxu0 %v3255_v29  ;;  %2794 = vmatprep.mubr.msk.f32.mxu0 %vm3142_vm0, %v3141_v0 }
 0xdaf   :  { %2788 = vmatprep.subr.mxu0 %v3141_v0 }
 0xdb0   :  { %2789 = vmatpush3.msra.mxu0 %v3260_v30 }
 0xdb1   :  { %2790 = vmatprep.subr.mxu0 %v3141_v0 }
 0xdb2   :  { %2791 = vmatpush3.msra.mxu0 %v3268_v31 }
 0xdb3   :  { %2792 = vmatprep.subr.mxu0 %v3141_v0 }
 0xdb4   :  { %2793 = vmatpush3.msra.mxu0 %v3277_v32 }
 0xdb5   :  { %2797 = vmatprep.subr.mxu0 %v3141_v0 }
 0xe61   :  { %v865_v21 = vpop.f32.mrf.mxu0 }
 0xe62   :  { %v866_v22 = vadd.f32 %v3321_v43, %v865_v21 }
 0xe63   :  { %v2744_v23 = vpop.f32.mrf.mxu0 }
 0xe64   :  { %2464 = vst.msk [vmem:[%s3783_s7 + $0x18] sm:$0xff] %vm291_vm4, %v866_v22  ;;  %v1266_v23 = vld [vmem:[#allocation2 + $0x30] sm:$0xff] }
 0xe6d   :  { %v955_v24 = vpop.f32.mrf.mxu0 }
 0xe6e   :  { %v956_v25 = vadd.f32 %v3244_v12, %v955_v24 }
 0xe6f   :  { %v2759_v26 = vpop.f32.mrf.mxu0 }
 0xe70   :  { %966 = vrot.lane.b32.xlu0 %v956_v25, %s3144_s23  ;;  %v2466_v27 = vmul.f32 -1.442695, %v956_v25 }
 0xe72   :  { %2990 = vpow2.f32 %v2466_v27 }
 0xe7f   :  { %v2991_v28 = vpop.eup %2990 }
 0xe80   :  { %v962_v33 = vadd.f32 1.0, %v2991_v28 }
 0xe82   :  { %2992 = vrcp.f32 %v962_v33 }
 0xe8f   :  { %v2993_v34 = vpop.eup %2992 }
 0xee2   :  { %v967_v35 = vpop.permute.xlu0 %966 }
 0xee3   :  { %v969_v36 = vmul.f32 %v2993_v34, %v967_v35 }
 0xee5   :  { %971 = vrot.lane.b32.xlu1 %v969_v36, %s3145_s24 }
 0xf57   :  { %v972_v37 = vpop.permute.xlu1 %971 }
 0xf58   :  { %v974_v38 = vadd.f32 %v972_v37, %v956_v25 }
 0xf5a   :  { %2994 = vtanh.f32 %v974_v38 }
 0xf67   :  { %v2995_v39 = vpop.eup %2994 }
 0xf68   :  { %v976_v41 = vsub.f32 %v878_v16, %v2995_v39 }
 0xf6a   :  { %978 = vrot.lane.b32.xlu0 %v976_v41, %s3147_s16 }
 0xf6e   :  { %1068 = vrot.lane.b32.xlu0 %v1066_v42, %s3145_s24 }
 0xfdc   :  { %v979_v44 = vpop.permute.xlu0 %978 }
 0xfdd   :  { %v981_v45 = vmul.f32 %v2993_v34, %v979_v44 }
 0xfdf   :  { %983 = vrot.lane.b32.xlu1 %v981_v45, %s3144_s23 }
 0xfe0   :  { %v1069_v47 = vpop.permute.xlu0 %1068 }
0x1051   :  { %v984_v46 = vpop.permute.xlu1 %983 }
0x1052   :  { %v986_v48 = vadd.f32 %v2995_v39, %v984_v46  ;;  %v1451_v46 = vld [vmem:[#allocation5 + $0x30] sm:$0xff] }
0x1054   :  { %v1071_v49 = vadd.f32 %v1069_v47, %v986_v48  ;;  %988 = vrot.lane.b32.xlu1 %v986_v48, %s3145_s24  ;;  %v1452_v48 = vmul.f32 0.05, %v1451_v46 }
0x1056   :  { %1075 = vrot.lane.b32.xlu0 %v1071_v49, %s3146_s11 }
0x10c6   :  { %v989_v50 = vpop.permute.xlu1 %988 }
0x10c7   :  { %2769 = vmatmul.mubr.msk.f32.vlgmr.msra.gmra.mxu1 %vm75_vm1, %v989_v50 }
0x10c8   :  { %2772 = vmatpush3.msra.mxu1 %v3212_v2  ;;  %2783 = vmatprep.mubr.msk.f32.mxu1 %vm3142_vm0, %v3141_v0  ;;  %v1076_v52 = vpop.permute.xlu0 %1075 }
0x10c9   :  { %2773 = vmatprep.subr.mxu1 %v3141_v0  ;;  %v1078_v53 = vsel %vm95_vm2, %v1073_v51, %v1076_v52 }
0x10ca   :  { %2774 = vmatpush3.msra.mxu1 %v3214_v3 }
0x10cb   :  { %2775 = vmatprep.subr.mxu1 %v3141_v0 }
0x10cc   :  { %2776 = vmatpush3.msra.mxu1 %v3219_v4 }
0x10cd   :  { %2777 = vmatprep.subr.mxu1 %v3141_v0 }
0x10ce   :  { %2778 = vmatpush3.msra.mxu1 %v3223_v5 }
0x10cf   :  { %2779 = vmatprep.subr.mxu1 %v3141_v0 }
0x10d0   :  { %2780 = vmatpush3.msra.mxu1 %v3227_v6 }
0x10d1   :  { %2781 = vmatprep.subr.mxu1 %v3141_v0 }
0x10d2   :  { %2782 = vmatpush3.msra.mxu1 %v3231_v8 }
0x10d3   :  { %2784 = vmatmul.mubr.msk.f32.vlgmr.msra.gmra.mxu1 %vm103_vm3, %v1078_v53  ;;  %2812 = vmatprep.subr.mxu1 %v3141_v0 }
0x10d4   :  { %2813 = vmatpush3.msra.mxu1 %v3255_v29  ;;  %2820 = vmatprep.mubr.msk.f32.mxu1 %vm3142_vm0, %v3141_v0 }
0x10d5   :  { %2814 = vmatprep.subr.mxu1 %v3141_v0 }
0x10d6   :  { %2815 = vmatpush3.msra.mxu1 %v3260_v30 }
0x10d7   :  { %2816 = vmatprep.subr.mxu1 %v3141_v0 }
0x10d8   :  { %2817 = vmatpush3.msra.mxu1 %v3268_v31 }
0x10d9   :  { %2818 = vmatprep.subr.mxu1 %v3141_v0 }
0x10da   :  { %2819 = vmatpush3.msra.mxu1 %v3277_v32 }
0x10db   :  { %2823 = vmatprep.subr.mxu1 %v3141_v0 }
0x1187   :  { %v1058_v54 = vpop.f32.mrf.mxu1 }
0x1188   :  { %v1059_v55 = vadd.f32 %v3321_v43, %v1058_v54 }
0x1189   :  { %v2770_v56 = vpop.f32.mrf.mxu1 }
0x118a   :  { %2468 = vst.msk [vmem:[%s3783_s7 + $0x20] sm:$0xff] %vm291_vm4, %v1059_v55  ;;  %v1459_v56 = vld [vmem:[#allocation2 + $0x38] sm:$0xff] }
0x1193   :  { %v1148_v57 = vpop.f32.mrf.mxu1 }
0x1194   :  { %v1149_v58 = vadd.f32 %v3244_v12, %v1148_v57 }
0x1195   :  { %v2785_v59 = vpop.f32.mrf.mxu1 }
0x1196   :  { %1159 = vrot.lane.b32.xlu1 %v1149_v58, %s3144_s23  ;;  %v2470_v60 = vmul.f32 -1.442695, %v1149_v58 }
0x1198   :  { %2996 = vpow2.f32 %v2470_v60 }
0x11a5   :  { %v2997_v61 = vpop.eup %2996 }
0x11a6   :  { %v1155_v62 = vadd.f32 1.0, %v2997_v61 }
0x11a8   :  { %2998 = vrcp.f32 %v1155_v62 }
0x11b5   :  { %v2999_v63 = vpop.eup %2998 }
0x1208   :  { %v1160_v1 = vpop.permute.xlu1 %1159 }
0x1209   :  { %v1162_v7 = vmul.f32 %v2999_v63, %v1160_v1 }
0x120b   :  { %1164 = vrot.lane.b32.xlu0 %v1162_v7, %s3145_s24 }
0x127d   :  { %v1165_v9 = vpop.permute.xlu0 %1164 }
0x127e   :  { %v1167_v10 = vadd.f32 %v1165_v9, %v1149_v58 }
0x1280   :  { %3000 = vtanh.f32 %v1167_v10 }
0x128d   :  { %v3001_v11 = vpop.eup %3000 }
0x128e   :  { %v1169_v14 = vsub.f32 %v1071_v49, %v3001_v11 }
0x1290   :  { %1171 = vrot.lane.b32.xlu1 %v1169_v14, %s3147_s16 }
0x1294   :  { %1261 = vrot.lane.b32.xlu1 %v1259_v15, %s3145_s24 }
0x1302   :  { %v1172_v16 = vpop.permute.xlu1 %1171 }
0x1303   :  { %v1174_v17 = vmul.f32 %v2999_v63, %v1172_v16 }
0x1305   :  { %1176 = vrot.lane.b32.xlu0 %v1174_v17, %s3144_s23 }
0x1306   :  { %v1262_v19 = vpop.permute.xlu1 %1261 }
0x1377   :  { %v1177_v18 = vpop.permute.xlu0 %1176 }
0x1378   :  { %v1179_v20 = vadd.f32 %v3001_v11, %v1177_v18  ;;  %v1644_v11 = vld [vmem:[#allocation5 + $0x38] sm:$0xff] }
0x137a   :  { %v1264_v21 = vadd.f32 %v1262_v19, %v1179_v20  ;;  %1181 = vrot.lane.b32.xlu0 %v1179_v20, %s3145_s24 }
0x137c   :  { %1268 = vrot.lane.b32.xlu1 %v1264_v21, %s3146_s11 }
0x13ec   :  { %v1182_v22 = vpop.permute.xlu0 %1181 }
0x13ed   :  { %2795 = vmatmul.mubr.msk.f32.vlgmr.msra.gmra.mxu0 %vm75_vm1, %v1182_v22  ;;  %v3583_v22 = vld [vmem:[#allocation7 + $0x20] sm:$0xff] }
0x13ee   :  { %2798 = vmatpush3.msra.mxu0 %v3212_v2  ;;  %2809 = vmatprep.mubr.msk.f32.mxu0 %vm3142_vm0, %v3141_v0  ;;  %v1269_v24 = vpop.permute.xlu1 %1268 }
0x13ef   :  { %2799 = vmatprep.subr.mxu0 %v3141_v0  ;;  %v1271_v25 = vsel %vm95_vm2, %v1266_v23, %v1269_v24  ;;  %v3587_v23 = vld [vmem:[#allocation7 + $0x18] sm:$0xff]  ;;  %v3591_v24 = vld [vmem:[#allocation7 + $0x10] sm:$0xff] }
0x13f0   :  { %2800 = vmatpush3.msra.mxu0 %v3214_v3 }
0x13f1   :  { %2801 = vmatprep.subr.mxu0 %v3141_v0 }
0x13f2   :  { %2802 = vmatpush3.msra.mxu0 %v3219_v4 }
0x13f3   :  { %2803 = vmatprep.subr.mxu0 %v3141_v0 }
0x13f4   :  { %2804 = vmatpush3.msra.mxu0 %v3223_v5 }
0x13f5   :  { %2805 = vmatprep.subr.mxu0 %v3141_v0 }
0x13f6   :  { %2806 = vmatpush3.msra.mxu0 %v3227_v6 }
0x13f7   :  { %2807 = vmatprep.subr.mxu0 %v3141_v0 }
0x13f8   :  { %2808 = vmatpush3.msra.mxu0 %v3231_v8 }
0x13f9   :  { %2810 = vmatmul.mubr.msk.f32.vlgmr.msra.gmra.mxu0 %vm103_vm3, %v1271_v25  ;;  %2838 = vmatprep.subr.mxu0 %v3141_v0  ;;  %v1652_v25 = vld [vmem:[#allocation2 + $0x40] sm:$0xff] }
0x13fa   :  { %2839 = vmatpush3.msra.mxu0 %v3255_v29  ;;  %2846 = vmatprep.mubr.msk.f32.mxu0 %vm3142_vm0, %v3141_v0 }
0x13fb   :  { %2840 = vmatprep.subr.mxu0 %v3141_v0 }
0x13fc   :  { %2841 = vmatpush3.msra.mxu0 %v3260_v30 }
0x13fd   :  { %2842 = vmatprep.subr.mxu0 %v3141_v0 }
0x13fe   :  { %2843 = vmatpush3.msra.mxu0 %v3268_v31 }
0x13ff   :  { %2844 = vmatprep.subr.mxu0 %v3141_v0 }
0x1400   :  { %2845 = vmatpush3.msra.mxu0 %v3277_v32 }
0x1401   :  { %2849 = vmatprep.subr.mxu0 %v3141_v0 }
0x14ad   :  { %v1251_v26 = vpop.f32.mrf.mxu0 }
0x14ae   :  { %v1252_v27 = vadd.f32 %v3321_v43, %v1251_v26 }
0x14af   :  { %v2796_v28 = vpop.f32.mrf.mxu0 }
0x14b0   :  { %2472 = vst.msk [vmem:[%s3783_s7 + $0x28] sm:$0xff] %vm291_vm4, %v1252_v27  ;;  %v3595_v27 = vld [vmem:[#allocation7 + $0x8] sm:$0xff] }
0x14b9   :  { %v1341_v33 = vpop.f32.mrf.mxu0 }
0x14ba   :  { %v1342_v34 = vadd.f32 %v3244_v12, %v1341_v33  ;;  %v3600_v33 = vld [vmem:[#allocation7] sm:$0xff] }
0x14bb   :  { %v2811_v35 = vpop.f32.mrf.mxu0 }
0x14bc   :  { %1352 = vrot.lane.b32.xlu0 %v1342_v34, %s3144_s23  ;;  %v2474_v36 = vmul.f32 -1.442695, %v1342_v34 }
0x14be   :  { %3002 = vpow2.f32 %v2474_v36 }
0x14cb   :  { %v3003_v37 = vpop.eup %3002 }
0x14cc   :  { %v1348_v38 = vadd.f32 1.0, %v3003_v37 }
0x14ce   :  { %3004 = vrcp.f32 %v1348_v38 }
0x14db   :  { %v3005_v39 = vpop.eup %3004 }
0x152e   :  { %v1353_v40 = vpop.permute.xlu0 %1352 }
0x152f   :  { %v1355_v41 = vmul.f32 %v3005_v39, %v1353_v40 }
0x1531   :  { %1357 = vrot.lane.b32.xlu1 %v1355_v41, %s3145_s24 }
0x15a3   :  { %v1358_v42 = vpop.permute.xlu1 %1357 }
0x15a4   :  { %v1360_v44 = vadd.f32 %v1358_v42, %v1342_v34 }
0x15a6   :  { %3006 = vtanh.f32 %v1360_v44 }
0x15b3   :  { %v3007_v45 = vpop.eup %3006 }
0x15b4   :  { %v1362_v47 = vsub.f32 %v1264_v21, %v3007_v45  ;;  %v3577_v21 = vld [vmem:[#allocation7 + $0x28] sm:$0xff] }
0x15b6   :  { %1364 = vrot.lane.b32.xlu0 %v1362_v47, %s3147_s16  ;;  %v1837_v47 = vld [vmem:[#allocation5 + $0x40] sm:$0xff] }
0x15ba   :  { %1454 = vrot.lane.b32.xlu0 %v1452_v48, %s3145_s24 }
0x1628   :  { %v1365_v49 = vpop.permute.xlu0 %1364 }
0x1629   :  { %v1367_v50 = vmul.f32 %v3005_v39, %v1365_v49  ;;  %v1838_v49 = vmul.f32 0.05, %v1837_v47 }
0x162b   :  { %1369 = vrot.lane.b32.xlu1 %v1367_v50, %s3144_s23 }
0x162c   :  { %v1455_v52 = vpop.permute.xlu0 %1454 }
0x169d   :  { %v1370_v51 = vpop.permute.xlu1 %1369 }
0x169e   :  { %v1372_v53 = vadd.f32 %v3007_v45, %v1370_v51 }
0x16a0   :  { %v1457_v54 = vadd.f32 %v1455_v52, %v1372_v53  ;;  %1374 = vrot.lane.b32.xlu1 %v1372_v53, %s3145_s24 }
0x16a2   :  { %1461 = vrot.lane.b32.xlu0 %v1457_v54, %s3146_s11 }
0x1712   :  { %v1375_v55 = vpop.permute.xlu1 %1374 }
0x1713   :  { %2821 = vmatmul.mubr.msk.f32.vlgmr.msra.gmra.mxu1 %vm75_vm1, %v1375_v55 }
0x1714   :  { %2824 = vmatpush3.msra.mxu1 %v3212_v2  ;;  %2835 = vmatprep.mubr.msk.f32.mxu1 %vm3142_vm0, %v3141_v0  ;;  %v1462_v57 = vpop.permute.xlu0 %1461 }
0x1715   :  { %2825 = vmatprep.subr.mxu1 %v3141_v0  ;;  %v1464_v2 = vsel %vm95_vm2, %v1459_v56, %v1462_v57  ;;  %v1845_v57 = vld [vmem:[#allocation2 + $0x48] sm:$0xff] }
0x1716   :  { %2826 = vmatpush3.msra.mxu1 %v3214_v3 }
0x1717   :  { %2827 = vmatprep.subr.mxu1 %v3141_v0 }
0x1718   :  { %2828 = vmatpush3.msra.mxu1 %v3219_v4 }
0x1719   :  { %2829 = vmatprep.subr.mxu1 %v3141_v0 }
0x171a   :  { %2830 = vmatpush3.msra.mxu1 %v3223_v5 }
0x171b   :  { %2831 = vmatprep.subr.mxu1 %v3141_v0 }
0x171c   :  { %2832 = vmatpush3.msra.mxu1 %v3227_v6 }
0x171d   :  { %2833 = vmatprep.subr.mxu1 %v3141_v0 }
0x171e   :  { %2834 = vmatpush3.msra.mxu1 %v3231_v8 }
0x171f   :  { %2836 = vmatmul.mubr.msk.f32.vlgmr.msra.gmra.mxu1 %vm103_vm3, %v1464_v2  ;;  %2864 = vmatprep.subr.mxu1 %v3141_v0 }
0x1720   :  { %2865 = vmatpush3.msra.mxu1 %v3255_v29  ;;  %2872 = vmatprep.mubr.msk.f32.mxu1 %vm3142_vm0, %v3141_v0 }
0x1721   :  { %2866 = vmatprep.subr.mxu1 %v3141_v0 }
0x1722   :  { %2867 = vmatpush3.msra.mxu1 %v3260_v30 }
0x1723   :  { %2868 = vmatprep.subr.mxu1 %v3141_v0 }
0x1724   :  { %2869 = vmatpush3.msra.mxu1 %v3268_v31 }
0x1725   :  { %2870 = vmatprep.subr.mxu1 %v3141_v0 }
0x1726   :  { %2871 = vmatpush3.msra.mxu1 %v3277_v32 }
0x1727   :  { %2875 = vmatprep.subr.mxu1 %v3141_v0 }
0x17d3   :  { %v1444_v3 = vpop.f32.mrf.mxu1 }
0x17d4   :  { %v1445_v4 = vadd.f32 %v3321_v43, %v1444_v3 }
0x17d5   :  { %v2822_v5 = vpop.f32.mrf.mxu1 }
0x17d6   :  { %2476 = vst.msk [vmem:[%s3783_s7 + $0x30] sm:$0xff] %vm291_vm4, %v1445_v4  ;;  %v3653_v4 = vld [vmem:[%s3781_s5 + $0x18] sm:$0xff]  ;;  %v3662_v5 = vld [vmem:[%s3781_s5 + $0x10] sm:$0xff] }
0x17df   :  { %v1534_v6 = vpop.f32.mrf.mxu1 }
0x17e0   :  { %v1535_v8 = vadd.f32 %v3244_v12, %v1534_v6  ;;  %v1645_v12 = vmul.f32 0.05, %v1644_v11  ;;  %v3669_v6 = vld [vmem:[%s3781_s5 + $0x8] sm:$0xff] }
0x17e1   :  { %v2837_v58 = vpop.f32.mrf.mxu1 }
0x17e2   :  { %1545 = vrot.lane.b32.xlu1 %v1535_v8, %s3144_s23  ;;  %v2478_v59 = vmul.f32 -1.442695, %v1535_v8 }
0x17e4   :  { %3008 = vpow2.f32 %v2478_v59 }
0x17f1   :  { %v3009_v60 = vpop.eup %3008 }
0x17f2   :  { %v1541_v61 = vadd.f32 1.0, %v3009_v60 }
0x17f4   :  { %3010 = vrcp.f32 %v1541_v61 }
0x1801   :  { %v3011_v62 = vpop.eup %3010 }
0x1854   :  { %v1546_v63 = vpop.permute.xlu1 %1545 }
0x1855   :  { %v1548_v1 = vmul.f32 %v3011_v62, %v1546_v63 }
0x1857   :  { %1550 = vrot.lane.b32.xlu0 %v1548_v1, %s3145_s24 }
0x18c9   :  { %v1551_v7 = vpop.permute.xlu0 %1550 }
0x18ca   :  { %v1553_v9 = vadd.f32 %v1551_v7, %v1535_v8  ;;  %v3676_v8 = vld [vmem:[%s3781_s5] sm:$0xff] }
0x18cc   :  { %3012 = vtanh.f32 %v1553_v9 }
0x18d9   :  { %v3013_v10 = vpop.eup %3012 }
0x18da   :  { %v1555_v13 = vsub.f32 %v1457_v54, %v3013_v10 }
0x18dc   :  { %1557 = vrot.lane.b32.xlu1 %v1555_v13, %s3147_s16 }
0x18e0   :  { %1647 = vrot.lane.b32.xlu1 %v1645_v12, %s3145_s24 }
0x194e   :  { %v1558_v14 = vpop.permute.xlu1 %1557 }
0x194f   :  { %v1560_v15 = vmul.f32 %v3011_v62, %v1558_v14 }
0x1951   :  { %1562 = vrot.lane.b32.xlu0 %v1560_v15, %s3144_s23  ;;  %v2030_v15 = vld [vmem:[#allocation5 + $0x48] sm:$0xff] }
0x1952   :  { %v1648_v17 = vpop.permute.xlu1 %1647 }
0x19c3   :  { %v1563_v16 = vpop.permute.xlu0 %1562 }
0x19c4   :  { %v1565_v18 = vadd.f32 %v3013_v10, %v1563_v16 }
0x19c6   :  { %v1650_v19 = vadd.f32 %v1648_v17, %v1565_v18  ;;  %1567 = vrot.lane.b32.xlu0 %v1565_v18, %s3145_s24  ;;  %v2031_v17 = vmul.f32 0.05, %v2030_v15 }
0x19c8   :  { %1654 = vrot.lane.b32.xlu1 %v1650_v19, %s3146_s11 }
0x1a38   :  { %v1568_v20 = vpop.permute.xlu0 %1567 }
0x1a39   :  { %2847 = vmatmul.mubr.msk.f32.vlgmr.msra.gmra.mxu0 %vm75_vm1, %v1568_v20 }
0x1a3a   :  { %2850 = vmatpush3.msra.mxu0 %v3577_v21  ;;  %2861 = vmatprep.mubr.msk.f32.mxu0 %vm3142_vm0, %v3141_v0  ;;  %v1655_v26 = vpop.permute.xlu1 %1654 }
0x1a3b   :  { %2851 = vmatprep.subr.mxu0 %v3141_v0  ;;  %v1657_v28 = vsel %vm95_vm2, %v1652_v25, %v1655_v26 }
0x1a3c   :  { %2852 = vmatpush3.msra.mxu0 %v3583_v22 }
0x1a3d   :  { %2853 = vmatprep.subr.mxu0 %v3141_v0 }
0x1a3e   :  { %2854 = vmatpush3.msra.mxu0 %v3587_v23 }
0x1a3f   :  { %2855 = vmatprep.subr.mxu0 %v3141_v0 }
0x1a40   :  { %2856 = vmatpush3.msra.mxu0 %v3591_v24 }
0x1a41   :  { %2857 = vmatprep.subr.mxu0 %v3141_v0 }
0x1a42   :  { %2858 = vmatpush3.msra.mxu0 %v3595_v27 }
0x1a43   :  { %2859 = vmatprep.subr.mxu0 %v3141_v0 }
0x1a44   :  { %2860 = vmatpush3.msra.mxu0 %v3600_v33 }
0x1a45   :  { %2862 = vmatmul.mubr.msk.f32.vlgmr.msra.gmra.mxu0 %vm103_vm3, %v1657_v28  ;;  %2890 = vmatprep.subr.mxu0 %v3141_v0 }
0x1a46   :  { %2891 = vmatpush3.msra.mxu0 %v3255_v29  ;;  %2898 = vmatprep.mubr.msk.f32.mxu0 %vm3142_vm0, %v3141_v0 }
0x1a47   :  { %2892 = vmatprep.subr.mxu0 %v3141_v0 }
0x1a48   :  { %2893 = vmatpush3.msra.mxu0 %v3260_v30 }
0x1a49   :  { %2894 = vmatprep.subr.mxu0 %v3141_v0 }
0x1a4a   :  { %2895 = vmatpush3.msra.mxu0 %v3268_v31  ;;  %v3623_v31 = vld [vmem:[%s3780_s4] ss:$0 sm:$0xff] }
0x1a4b   :  { %2896 = vmatprep.subr.mxu0 %v3141_v0 }
0x1a4c   :  { %2897 = vmatpush3.msra.mxu0 %v3277_v32 }
0x1a4d   :  { %2901 = vmatprep.subr.mxu0 %v3141_v0 }
0x1af9   :  { %v1637_v34 = vpop.f32.mrf.mxu0 }
0x1afa   :  { %v1638_v29 = vadd.f32 %v3321_v43, %v1637_v34 }
0x1afb   :  { %v2848_v35 = vpop.f32.mrf.mxu0 }
0x1afc   :  { %2480 = vst.msk [vmem:[%s3783_s7 + $0x38] sm:$0xff] %vm291_vm4, %v1638_v29  ;;  %v2038_v29 = vld [vmem:[#allocation2 + $0x50] sm:$0xff] }
0x1b05   :  { %v1727_v30 = vpop.f32.mrf.mxu0 }
0x1b06   :  { %v1728_v36 = vadd.f32 %v3623_v31, %v1727_v30 }
0x1b07   :  { %v2863_v32 = vpop.f32.mrf.mxu0 }
0x1b08   :  { %1738 = vrot.lane.b32.xlu0 %v1728_v36, %s3144_s23  ;;  %v2482_v37 = vmul.f32 -1.442695, %v1728_v36  ;;  %v3722_v32 = vld [vmem:[%s3782_s6] ss:$0 sm:$0xff] }
0x1b0a   :  { %3014 = vpow2.f32 %v2482_v37 }
0x1b17   :  { %v3015_v38 = vpop.eup %3014 }
0x1b18   :  { %v1734_v39 = vadd.f32 1.0, %v3015_v38 }
0x1b1a   :  { %3016 = vrcp.f32 %v1734_v39 }
0x1b27   :  { %v3017_v40 = vpop.eup %3016 }
0x1b7a   :  { %v1739_v41 = vpop.permute.xlu0 %1738 }
0x1b7b   :  { %v1741_v42 = vmul.f32 %v3017_v40, %v1739_v41 }
0x1b7d   :  { %1743 = vrot.lane.b32.xlu1 %v1741_v42, %s3145_s24 }
0x1bef   :  { %v1744_v44 = vpop.permute.xlu1 %1743 }
0x1bf0   :  { %v1746_v45 = vadd.f32 %v1744_v44, %v1728_v36 }
0x1bf2   :  { %3018 = vtanh.f32 %v1746_v45 }
0x1bff   :  { %v3019_v46 = vpop.eup %3018 }
0x1c00   :  { %v1748_v48 = vsub.f32 %v1650_v19, %v3019_v46 }
0x1c02   :  { %1750 = vrot.lane.b32.xlu0 %v1748_v48, %s3147_s16 }
0x1c06   :  { %1840 = vrot.lane.b32.xlu0 %v1838_v49, %s3145_s24 }
0x1c74   :  { %v1751_v50 = vpop.permute.xlu0 %1750 }
0x1c75   :  { %v1753_v51 = vmul.f32 %v3017_v40, %v1751_v50 }
0x1c77   :  { %1755 = vrot.lane.b32.xlu1 %v1753_v51, %s3144_s23 }
0x1c78   :  { %v1841_v53 = vpop.permute.xlu0 %1840 }
0x1ce9   :  { %v1756_v52 = vpop.permute.xlu1 %1755 }
0x1cea   :  { %v1758_v54 = vadd.f32 %v3019_v46, %v1756_v52  ;;  %v2223_v52 = vld [vmem:[#allocation5 + $0x50] sm:$0xff] }
0x1cec   :  { %v1843_v55 = vadd.f32 %v1841_v53, %v1758_v54  ;;  %1760 = vrot.lane.b32.xlu1 %v1758_v54, %s3145_s24  ;;  %v2224_v54 = vmul.f32 0.05, %v2223_v52 }
0x1cee   :  { %1847 = vrot.lane.b32.xlu0 %v1843_v55, %s3146_s11 }
0x1d5e   :  { %v1761_v56 = vpop.permute.xlu1 %1760 }
0x1d5f   :  { %2873 = vmatmul.mubr.msk.f32.vlgmr.msra.gmra.mxu1 %vm75_vm1, %v1761_v56 }
0x1d60   :  { %2876 = vmatpush3.msra.mxu1 %v3577_v21  ;;  %2887 = vmatprep.mubr.msk.f32.mxu1 %vm3142_vm0, %v3141_v0  ;;  %v1848_v2 = vpop.permute.xlu0 %1847 }
0x1d61   :  { %2877 = vmatprep.subr.mxu1 %v3141_v0  ;;  %v1850_v3 = vsel %vm95_vm2, %v1845_v57, %v1848_v2 }
0x1d62   :  { %2878 = vmatpush3.msra.mxu1 %v3583_v22 }
0x1d63   :  { %2879 = vmatprep.subr.mxu1 %v3141_v0 }
0x1d64   :  { %2880 = vmatpush3.msra.mxu1 %v3587_v23 }
0x1d65   :  { %2881 = vmatprep.subr.mxu1 %v3141_v0 }
0x1d66   :  { %2882 = vmatpush3.msra.mxu1 %v3591_v24 }
0x1d67   :  { %2883 = vmatprep.subr.mxu1 %v3141_v0 }
0x1d68   :  { %2884 = vmatpush3.msra.mxu1 %v3595_v27 }
0x1d69   :  { %2885 = vmatprep.subr.mxu1 %v3141_v0 }
0x1d6a   :  { %2886 = vmatpush3.msra.mxu1 %v3600_v33 }
0x1d6b   :  { %2888 = vmatmul.mubr.msk.f32.vlgmr.msra.gmra.mxu1 %vm103_vm3, %v1850_v3  ;;  %2916 = vmatprep.subr.mxu1 %v3141_v0 }
0x1d6c   :  { %2917 = vmatpush3.msra.mxu1 %v3653_v4  ;;  %2924 = vmatprep.mubr.msk.f32.mxu1 %vm3142_vm0, %v3141_v0 }
0x1d6d   :  { %2918 = vmatprep.subr.mxu1 %v3141_v0 }
0x1d6e   :  { %2919 = vmatpush3.msra.mxu1 %v3662_v5 }
0x1d6f   :  { %2920 = vmatprep.subr.mxu1 %v3141_v0 }
0x1d70   :  { %2921 = vmatpush3.msra.mxu1 %v3669_v6 }
0x1d71   :  { %2922 = vmatprep.subr.mxu1 %v3141_v0 }
0x1d72   :  { %2923 = vmatpush3.msra.mxu1 %v3676_v8 }
0x1d73   :  { %2927 = vmatprep.subr.mxu1 %v3141_v0 }
0x1e1f   :  { %v1830_v58 = vpop.f32.mrf.mxu1 }
0x1e20   :  { %v1831_v59 = vadd.f32 %v3321_v43, %v1830_v58 }
0x1e21   :  { %v2874_v60 = vpop.f32.mrf.mxu1 }
0x1e22   :  { %2484 = vst.msk [vmem:[%s3783_s7 + $0x40] sm:$0xff] %vm291_vm4, %v1831_v59 }
0x1e2b   :  { %v1920_v61 = vpop.f32.mrf.mxu1 }
0x1e2c   :  { %v1921_v62 = vadd.f32 %v3623_v31, %v1920_v61 }
0x1e2d   :  { %v2889_v63 = vpop.f32.mrf.mxu1 }
0x1e2e   :  { %1931 = vrot.lane.b32.xlu1 %v1921_v62, %s3144_s23  ;;  %v2486_v1 = vmul.f32 -1.442695, %v1921_v62 }
0x1e30   :  { %3020 = vpow2.f32 %v2486_v1 }
0x1e3d   :  { %v3021_v7 = vpop.eup %3020 }
0x1e3e   :  { %v1927_v9 = vadd.f32 1.0, %v3021_v7 }
0x1e40   :  { %3022 = vrcp.f32 %v1927_v9 }
0x1e4d   :  { %v3023_v10 = vpop.eup %3022 }
0x1ea0   :  { %v1932_v11 = vpop.permute.xlu1 %1931 }
0x1ea1   :  { %v1934_v43 = vmul.f32 %v3023_v10, %v1932_v11  ;;  %v2416_v11 = vld [vmem:[#allocation5 + $0x58] sm:$0xff] }
0x1ea3   :  { %1936 = vrot.lane.b32.xlu0 %v1934_v43, %s3145_s24 }
0x1f15   :  { %v1937_v13 = vpop.permute.xlu0 %1936 }
0x1f16   :  { %v1939_v12 = vadd.f32 %v1937_v13, %v1921_v62  ;;  %v2417_v13 = vmul.f32 0.05, %v2416_v11 }
0x1f18   :  { %3024 = vtanh.f32 %v1939_v12 }
0x1f25   :  { %v3025_v14 = vpop.eup %3024 }
0x1f26   :  { %v1941_v16 = vsub.f32 %v1843_v55, %v3025_v14 }
0x1f28   :  { %1943 = vrot.lane.b32.xlu1 %v1941_v16, %s3147_s16 }
0x1f2c   :  { %2033 = vrot.lane.b32.xlu1 %v2031_v17, %s3145_s24 }
0x1f9a   :  { %v1944_v18 = vpop.permute.xlu1 %1943 }
0x1f9b   :  { %v1946_v19 = vmul.f32 %v3023_v10, %v1944_v18 }
0x1f9d   :  { %1948 = vrot.lane.b32.xlu0 %v1946_v19, %s3144_s23 }
0x1f9e   :  { %v2034_v25 = vpop.permute.xlu1 %2033 }
0x200f   :  { %v1949_v20 = vpop.permute.xlu0 %1948 }
0x2010   :  { %v1951_v26 = vadd.f32 %v3025_v14, %v1949_v20 }
0x2012   :  { %v2036_v28 = vadd.f32 %v2034_v25, %v1951_v26  ;;  %1953 = vrot.lane.b32.xlu0 %v1951_v26, %s3145_s24 }
0x2014   :  { %2040 = vrot.lane.b32.xlu1 %v2036_v28, %s3146_s11 }
0x2084   :  { %v1954_v34 = vpop.permute.xlu0 %1953 }
0x2085   :  { %2899 = vmatmul.mubr.msk.f32.vlgmr.msra.gmra.mxu0 %vm75_vm1, %v1954_v34 }
0x2086   :  { %2902 = vmatpush3.msra.mxu0 %v3577_v21  ;;  %2913 = vmatprep.mubr.msk.f32.mxu0 %vm3142_vm0, %v3141_v0  ;;  %v2041_v35 = vpop.permute.xlu1 %2040 }
0x2087   :  { %2903 = vmatprep.subr.mxu0 %v3141_v0  ;;  %v2043_v30 = vsel %vm95_vm2, %v2038_v29, %v2041_v35 }
0x2088   :  { %2904 = vmatpush3.msra.mxu0 %v3583_v22 }
0x2089   :  { %2905 = vmatprep.subr.mxu0 %v3141_v0 }
0x208a   :  { %2906 = vmatpush3.msra.mxu0 %v3587_v23 }
0x208b   :  { %2907 = vmatprep.subr.mxu0 %v3141_v0 }
0x208c   :  { %2908 = vmatpush3.msra.mxu0 %v3591_v24 }
0x208d   :  { %2909 = vmatprep.subr.mxu0 %v3141_v0 }
0x208e   :  { %2910 = vmatpush3.msra.mxu0 %v3595_v27 }
0x208f   :  { %2911 = vmatprep.subr.mxu0 %v3141_v0 }
0x2090   :  { %2912 = vmatpush3.msra.mxu0 %v3600_v33 }
0x2091   :  { %2914 = vmatmul.mubr.msk.f32.vlgmr.msra.gmra.mxu0 %vm103_vm3, %v2043_v30  ;;  %2942 = vmatprep.subr.mxu0 %v3141_v0 }
0x2092   :  { %2943 = vmatpush3.msra.mxu0 %v3653_v4  ;;  %2950 = vmatprep.mubr.msk.f32.mxu0 %vm3142_vm0, %v3141_v0 }
0x2093   :  { %2944 = vmatprep.subr.mxu0 %v3141_v0 }
0x2094   :  { %2945 = vmatpush3.msra.mxu0 %v3662_v5 }
0x2095   :  { %2946 = vmatprep.subr.mxu0 %v3141_v0 }
0x2096   :  { %2947 = vmatpush3.msra.mxu0 %v3669_v6  ;;  %v2231_v6 = vld [vmem:[#allocation2 + $0x58] sm:$0xff] }
0x2097   :  { %2948 = vmatprep.subr.mxu0 %v3141_v0 }
0x2098   :  { %2949 = vmatpush3.msra.mxu0 %v3676_v8 }
0x2145   :  { %v2023_v36 = vpop.f32.mrf.mxu0 }
0x2146   :  { %v2024_v37 = vadd.f32 %v3722_v32, %v2023_v36 }
0x2147   :  { %v2900_v38 = vpop.f32.mrf.mxu0 }
0x2148   :  { %2488 = vst.msk [vmem:[%s3783_s7 + $0x48] sm:$0xff] %vm291_vm4, %v2024_v37 }
0x2151   :  { %v2113_v39 = vpop.f32.mrf.mxu0 }
0x2152   :  { %v2114_v40 = vadd.f32 %v3623_v31, %v2113_v39 }
0x2153   :  { %v2915_v41 = vpop.f32.mrf.mxu0 }
0x2154   :  { %2124 = vrot.lane.b32.xlu0 %v2114_v40, %s3144_s23  ;;  %v2490_v42 = vmul.f32 -1.442695, %v2114_v40 }
0x2156   :  { %3026 = vpow2.f32 %v2490_v42 }
0x2163   :  { %v3027_v44 = vpop.eup %3026 }
0x2164   :  { %v2120_v45 = vadd.f32 1.0, %v3027_v44 }
0x2166   :  { %3028 = vrcp.f32 %v2120_v45 }
0x2173   :  { %v3029_v46 = vpop.eup %3028 }
0x21c6   :  { %v2125_v47 = vpop.permute.xlu0 %2124 }
0x21c7   :  { %v2127_v48 = vmul.f32 %v3029_v46, %v2125_v47 }
0x21c9   :  { %2129 = vrot.lane.b32.xlu1 %v2127_v48, %s3145_s24 }
0x223b   :  { %v2130_v49 = vpop.permute.xlu1 %2129 }
0x223c   :  { %v2132_v50 = vadd.f32 %v2130_v49, %v2114_v40 }
0x223e   :  { %3030 = vtanh.f32 %v2132_v50 }
0x224b   :  { %v3031_v51 = vpop.eup %3030 }
0x224c   :  { %v2134_v53 = vsub.f32 %v2036_v28, %v3031_v51 }
0x224e   :  { %2136 = vrot.lane.b32.xlu0 %v2134_v53, %s3147_s16 }
0x2252   :  { %2226 = vrot.lane.b32.xlu0 %v2224_v54, %s3145_s24 }
0x22c0   :  { %v2137_v55 = vpop.permute.xlu0 %2136 }
0x22c1   :  { %v2139_v56 = vmul.f32 %v3029_v46, %v2137_v55 }
0x22c3   :  { %2141 = vrot.lane.b32.xlu1 %v2139_v56, %s3144_s23 }
0x22c4   :  { %v2227_v2 = vpop.permute.xlu0 %2226 }
0x2335   :  { %v2142_v57 = vpop.permute.xlu1 %2141 }
0x2336   :  { %v2144_v3 = vadd.f32 %v3031_v51, %v2142_v57 }
0x2338   :  { %v2229_v4 = vadd.f32 %v2227_v2, %v2144_v3  ;;  %2146 = vrot.lane.b32.xlu1 %v2144_v3, %s3145_s24 }
0x233a   :  { %2233 = vrot.lane.b32.xlu0 %v2229_v4, %s3146_s11 }
0x23aa   :  { %v2147_v5 = vpop.permute.xlu1 %2146 }
0x23ab   :  { %2925 = vmatmul.mubr.msk.f32.vlgmr.msra.gmra.mxu1 %vm75_vm1, %v2147_v5 }
0x23ac   :  { %2928 = vmatpush3.msra.mxu1 %v3577_v21  ;;  %2939 = vmatprep.mubr.msk.f32.mxu1 %vm3142_vm0, %v3141_v0  ;;  %v2234_v8 = vpop.permute.xlu0 %2233 }
0x23ad   :  { %2929 = vmatprep.subr.mxu1 %v3141_v0  ;;  %v2236_v21 = vsel %vm95_vm2, %v2231_v6, %v2234_v8 }
0x23ae   :  { %2930 = vmatpush3.msra.mxu1 %v3583_v22 }
0x23af   :  { %2931 = vmatprep.subr.mxu1 %v3141_v0 }
0x23b0   :  { %2932 = vmatpush3.msra.mxu1 %v3587_v23 }
0x23b1   :  { %2933 = vmatprep.subr.mxu1 %v3141_v0 }
0x23b2   :  { %2934 = vmatpush3.msra.mxu1 %v3591_v24 }
0x23b3   :  { %2935 = vmatprep.subr.mxu1 %v3141_v0 }
0x23b4   :  { %2936 = vmatpush3.msra.mxu1 %v3595_v27 }
0x23b5   :  { %2937 = vmatprep.subr.mxu1 %v3141_v0 }
0x23b6   :  { %2938 = vmatpush3.msra.mxu1 %v3600_v33 }
0x23b7   :  { %2940 = vmatmul.mubr.msk.f32.vlgmr.msra.gmra.mxu1 %vm103_vm3, %v2236_v21 }
0x246b   :  { %v2216_v22 = vpop.f32.mrf.mxu1 }
0x246c   :  { %v2217_v23 = vadd.f32 %v3722_v32, %v2216_v22 }
0x246d   :  { %v2926_v58 = vpop.f32.mrf.mxu1 }
0x246e   :  { %2492 = vst.msk [vmem:[%s3783_s7 + $0x50] sm:$0xff] %vm291_vm4, %v2217_v23 }
0x2477   :  { %v2306_v24 = vpop.f32.mrf.mxu1 }
0x2478   :  { %v2307_v27 = vadd.f32 %v3623_v31, %v2306_v24 }
0x2479   :  { %v2941_v59 = vpop.f32.mrf.mxu1 }
0x247a   :  { %2317 = vrot.lane.b32.xlu1 %v2307_v27, %s3144_s23  ;;  %v2494_v0 = vmul.f32 -1.442695, %v2307_v27 }
0x247c   :  { %3032 = vpow2.f32 %v2494_v0 }
0x2489   :  { %v3033_v33 = vpop.eup %3032 }
0x248a   :  { %v2313_v60 = vadd.f32 1.0, %v3033_v33 }
0x248c   :  { %3034 = vrcp.f32 %v2313_v60 }
0x2499   :  { %v3035_v61 = vpop.eup %3034 }
0x24ec   :  { %v2318_v62 = vpop.permute.xlu1 %2317 }
0x24ed   :  { %v2320_v63 = vmul.f32 %v3035_v61, %v2318_v62 }
0x24ef   :  { %2322 = vrot.lane.b32.xlu0 %v2320_v63, %s3145_s24 }
0x2561   :  { %v2323_v1 = vpop.permute.xlu0 %2322 }
0x2562   :  { %v2325_v7 = vadd.f32 %v2323_v1, %v2307_v27 }
0x2564   :  { %3036 = vtanh.f32 %v2325_v7 }
0x2571   :  { %v3037_v9 = vpop.eup %3036 }
0x2572   :  { %v2327_v10 = vsub.f32 %v2229_v4, %v3037_v9 }
0x2574   :  { %2329 = vrot.lane.b32.xlu1 %v2327_v10, %s3147_s16  ;;  %s3148_s16 = smov [#allocation8]  }
0x2575   :  { %s2436_s21 = sshll.u32 %s3148_s16, 4  ;;  %s2437_s21 = int_to_ptr.vmem [resolvable:$true] %s2436_s21 }
0x2576   :  { %p3115_p2 = scmp.lt.s32.totalorder %s2437_s21, %s2437_s21 }
0x25e6   :  { %v2330_v31 = vpop.permute.xlu1 %2329 }
0x25e7   :  { %v2332_v43 = vmul.f32 %v3035_v61, %v2330_v31 }
0x25e9   :  { %2334 = vrot.lane.b32.xlu0 %v2332_v43, %s3144_s23  ;;  %s3110_s23 = scalar_lea.vmem %s2437_s21, 128 }
0x25ea   :  { %p3111_p1 = scmp.ne.s32.totalorder %s2437_s21, %s3110_s23  ;;  %p3116_p3 = scmp.lt.s32.totalorder %s3110_s23, %s3110_s23 }
0x25ec   :  { %p3117_p4 = por %p3116_p3, %p3115_p2 }
0x25ed   :  { %2419 = vrot.lane.b32.xlu0 %v2417_v13, %s3145_s24 }
0x25ee   :  { %p3118_p5 = pnand %p3117_p4, %p3111_p1 }
0x265b   :  { %v2335_v12 = vpop.permute.xlu0 %2334 }
0x265c   :  { %v2337_v14 = vadd.f32 %v3037_v9, %v2335_v12 }
0x265e   :  { %2339 = vrot.lane.b32.xlu1 %v2337_v14, %s3145_s24 }
0x265f   :  { %v2420_v15 = vpop.permute.xlu0 %2419 }
0x2660   :  { %v2422_v16 = vadd.f32 %v2420_v15, %v2337_v14 }
0x2662   :  { %2424 = vrot.lane.b32.xlu1 %v2422_v16, %s3145_s24 }
0x26d0   :  { %v2340_v17 = vpop.permute.xlu1 %2339 }
0x26d1   :  { %2951 = vmatmul.mubr.msk.f32.vlgmr.msra.gmra.mxu0 %vm75_vm1, %v2340_v17 }
0x26d4   :  { %v2425_v18 = vpop.permute.xlu1 %2424 }
0x26d5   :  { %2427 = vst.msk [vmem:[#allocation8] sm:$0xff] %vm75_vm1, %v2425_v18 }
0x26d6   :  { %3121 = shalt.err (!%p3118_p5)
}
0x26d7   :  { %2439 = dma.vmem_to_hbm [thread:$0]  %s2437_s21, 128, %s3784_s8, [#allocation4]  }
0x2791   :  { %v2409_v19 = vpop.f32.mrf.mxu0 }
0x2792   :  { %v2410_v20 = vadd.f32 %v3722_v32, %v2409_v19 }
0x2793   :  { %v2952_v25 = vpop.f32.mrf.mxu0 }
0x2794   :  { %2496 = vst.msk [vmem:[%s3783_s7 + $0x58] sm:$0xff] %vm291_vm4, %v2410_v20 }
0x2795   :  { %3134 = dma.done.wait [#allocation4], 128  }
0x2796   :  { %3135 = vsyncadd [#allocation4], 4294967168 }
0x2797   :  { %2445 = vsyncpa [#allocation3], 1 }
0x2798   :  { %2446 = vsyncpa [#allocation6], 1 }
0x2799   :  { %2447 = vsyncpa [#allocation4], 1 }

</bundles_post_ra>
